<compile_context>
chip_gen: v7x
topology: tpu7x:2x2x1
jax: 0.10.0
libtpu: 0.0.40
codegen_flags: <defaults>
</compile_context>

<pallas_src>
import jax
import jax.numpy as jnp
from jax.experimental import pallas as pl
from jax.experimental.pallas import tpu as pltpu


def _siamese_kernel(emb1_ref, emb2_ref, mask1_ref, mask2_ref,
                    w1_ref, w2_ref, b_ref, labels_ref,
                    logits_ref, nll_ref,
                    sum1_ref, sum2_ref, cnt1_ref, cnt2_ref):
    s_idx = pl.program_id(1)

    # ---- init accumulators at the first seq block of each batch block ----
    @pl.when(s_idx == 0)
    def _():
        sum1_ref[...] = jnp.zeros_like(sum1_ref)
        sum2_ref[...] = jnp.zeros_like(sum2_ref)
        cnt1_ref[...] = jnp.zeros_like(cnt1_ref)
        cnt2_ref[...] = jnp.zeros_like(cnt2_ref)

    m1 = mask1_ref[...]                              # [TB, TS] bf16 (0/1)
    m2 = mask2_ref[...]

    # Masked partial sums on the MXU: one (1, TS) x (TS, H) matmul per batch
    # row, accumulated in f32.  Avoids materializing a (TB, TS, H) f32 temp.
    sum1_ref[...] += jnp.einsum(
        'bks,bsh->bkh', m1[:, None, :], emb1_ref[...],
        preferred_element_type=jnp.float32)[:, 0, :]            # [TB, H]
    sum2_ref[...] += jnp.einsum(
        'bks,bsh->bkh', m2[:, None, :], emb2_ref[...],
        preferred_element_type=jnp.float32)[:, 0, :]
    cnt1_ref[...] += jnp.sum(m1.astype(jnp.float32), axis=1, keepdims=True)
    cnt2_ref[...] += jnp.sum(m2.astype(jnp.float32), axis=1, keepdims=True)

    # ---- finalize: Linear(2H->2) + per-example cross-entropy ----
    @pl.when(s_idx == pl.num_programs(1) - 1)
    def _():
        pooled1 = sum1_ref[...] / jnp.maximum(cnt1_ref[...], 1e-9)   # [TB, H]
        pooled2 = sum2_ref[...] / jnp.maximum(cnt2_ref[...], 1e-9)

        # concat([p1, p2], -1) @ W^T + b == p1 @ W1^T + p2 @ W2^T + b
        # (W halves stay in the PyTorch (2, H) layout; contract over H.)
        dn = (((1,), (1,)), ((), ()))
        logits = (jax.lax.dot_general(pooled1, w1_ref[...], dn,
                                      preferred_element_type=jnp.float32)
                  + jax.lax.dot_general(pooled2, w2_ref[...], dn,
                                        preferred_element_type=jnp.float32)
                  + b_ref[...])                                      # [TB, 2]
        logits_ref[...] = logits

        m = jnp.max(logits, axis=-1, keepdims=True)                  # [TB, 1]
        lse = m + jnp.log(jnp.sum(jnp.exp(logits - m), axis=-1, keepdims=True))
        labels = labels_ref[...]                                     # [TB, 1]
        col = jax.lax.broadcasted_iota(jnp.int32, logits.shape, 1)   # [TB, 2]
        picked = jnp.sum(logits * (col == labels).astype(jnp.float32),
                         axis=-1, keepdims=True)                     # [TB, 1]
        nll_ref[...] = lse - picked                                  # per-example NLL


def _round_up(x, m):
    return pl.cdiv(x, m) * m


def siamese_forward(emb1, emb2, mask1, mask2, weight, bias, labels,
                    *, tb=32, ts=256):
    """SiameseNet head forward.

    emb*:   [B, S, H]  token embeddings from model0 (ideally already bf16)
    mask*:  [B, S]     {0,1} attention masks
    weight: [2, 2H]    nn.Linear(2H, 2) weight (PyTorch layout)
    bias:   [2]
    labels: [B] int32
    Returns (mean cross-entropy loss scalar, logits [B, 2]).
    """
    B, S, H = emb1.shape

    # --- tile selection ---
    b8 = _round_up(B, 8)
    tb = min(tb, b8)
    # Keep >=2 batch blocks when the batch allows it so the "parallel" axis
    # actually shards across v7x's two TensorCores (no-op on v5e/v6e).
    if b8 // tb < 2 and b8 >= 16:
        tb = max(8, (b8 // 2) // 8 * 8)
    ts = min(ts, _round_up(S, 16))          # keep ts a multiple of 16 (bf16)

    Bp = _round_up(B, tb)
    Sp = _round_up(S, ts)

    # --- input massaging (all no-ops when model0 already emits bf16 at
    #     tile-aligned shapes, which is the intended production config) ---
    def prep_emb(e):
        if e.dtype != jnp.bfloat16:
            e = e.astype(jnp.bfloat16)                  # halve HBM traffic
        if (Bp, Sp) != (B, S):
            # zero-pad remainders so padded blocks never read undefined data
            e = jnp.pad(e, ((0, Bp - B), (0, Sp - S), (0, 0)))
        return e

    def prep_mask(m):
        m = m.astype(jnp.bfloat16)                      # 0/1 is exact in bf16
        if (Bp, Sp) != (B, S):
            m = jnp.pad(m, ((0, Bp - B), (0, Sp - S)))
        return m

    emb1p, emb2p = prep_emb(emb1), prep_emb(emb2)
    mask1p, mask2p = prep_mask(mask1), prep_mask(mask2)

    labelsp = labels.astype(jnp.int32)
    if Bp != B:
        labelsp = jnp.pad(labelsp, ((0, Bp - B),))
    labelsp = labelsp[:, None]                          # [Bp, 1]

    # Split nn.Linear(2H, 2): weight [2, 2H] -> two [2, H] halves.
    w1 = weight[:, :H].astype(jnp.float32)
    w2 = weight[:, H:].astype(jnp.float32)
    b2d = bias.astype(jnp.float32)[None, :]             # [1, 2]

    nb, ns = Bp // tb, Sp // ts

    emb_spec = pl.BlockSpec((tb, ts, H), lambda b, s: (b, s, 0))
    msk_spec = pl.BlockSpec((tb, ts), lambda b, s: (b, s))       # lane-dense 2D
    w_spec = pl.BlockSpec((2, H), lambda b, s: (0, 0))
    b_spec = pl.BlockSpec((1, 2), lambda b, s: (0, 0))
    lab_spec = pl.BlockSpec((tb, 1), lambda b, s: (b, 0))

    logits_spec = pl.BlockSpec((tb, 2), lambda b, s: (b, 0))
    nll_spec = pl.BlockSpec((tb, 1), lambda b, s: (b, 0))

    # VMEM budget: 2 emb streams + 2 mask streams, double-buffered, plus slack.
    emb_block_bytes = tb * ts * H * 2
    msk_block_bytes = tb * ts * 2
    vmem_limit = int(min(4 * (emb_block_bytes + msk_block_bytes) + 16 * 2**20,
                         64 * 2**20))

    logits, nll = pl.pallas_call(
        _siamese_kernel,
        grid=(nb, ns),
        in_specs=[emb_spec, emb_spec, msk_spec, msk_spec,
                  w_spec, w_spec, b_spec, lab_spec],
        out_specs=(logits_spec, nll_spec),
        out_shape=(jax.ShapeDtypeStruct((Bp, 2), jnp.float32),
                   jax.ShapeDtypeStruct((Bp, 1), jnp.float32)),
        scratch_shapes=[pltpu.VMEM((tb, H), jnp.float32),
                        pltpu.VMEM((tb, H), jnp.float32),
                        pltpu.VMEM((tb, 1), jnp.float32),
                        pltpu.VMEM((tb, 1), jnp.float32)],
        compiler_params=pltpu.CompilerParams(
            dimension_semantics=("parallel", "arbitrary"),
            vmem_limit_bytes=vmem_limit),
    )(emb1p, emb2p, mask1p, mask2p, w1, w2, b2d, labelsp)

    logits = logits[:B]
    loss = jnp.sum(nll[:B, 0]) / B   # CrossEntropyLoss mean over *global* batch
    return loss, logits


def reference_forward(emb1, emb2, mask1, mask2, weight, bias, labels):
    """Pure-JAX reference on the same (bf16) encoder outputs."""
    def pool(e, m):
        e = e.astype(jnp.float32)
        m = m.astype(jnp.float32)
        s = jnp.sum(e * m[:, :, None], axis=1)
        d = jnp.maximum(jnp.sum(m, axis=1, keepdims=True), 1e-9)
        return s / d

    concat = jnp.concatenate([pool(emb1, mask1), pool(emb2, mask2)], axis=-1)
    logits = concat @ weight.T.astype(jnp.float32) + bias.astype(jnp.float32)
    logp = jax.nn.log_softmax(logits, axis=-1)
    nll = -jnp.take_along_axis(logp, labels[:, None], axis=-1)
    return jnp.mean(nll), logits


if __name__ == "__main__":
    # Small but tile-aligned, lane-dense shapes: H multiple of 128, S a
    # multiple of the seq tile, embeddings already bf16 -> the wrapper adds
    # zero extra HBM passes (no cast, no pad).
    B, S, H = 16, 512, 128

    key = jax.random.PRNGKey(0)
    k1, k2, k3, k4, k5 = jax.random.split(key, 5)

    # Stand-ins for model0(features{1,2})['token_embeddings'] (bf16) + masks.
    emb1 = jax.random.normal(k1, (B, S, H), dtype=jnp.bfloat16)
    emb2 = jax.random.normal(k2, (B, S, H), dtype=jnp.bfloat16)
    lens = jax.random.randint(k5, (B,), 1, S + 1)
    mask1 = (jnp.arange(S)[None, :] < lens[:, None]).astype(jnp.float32)
    mask2 = jnp.ones((B, S), jnp.float32)

    # nn.Linear(2H, 2): weight [2, 2H], bias [2].
    weight = (jax.random.normal(k3, (2, 2 * H), dtype=jnp.float32)
              * (1.0 / jnp.sqrt(2.0 * H)))
    bias = jnp.zeros((2,), dtype=jnp.float32)

    labels = jax.random.randint(k4, (B,), 0, 2, dtype=jnp.int32)

    loss, logits = siamese_forward(emb1, emb2, mask1, mask2, weight, bias, labels)
    jax.block_until_ready((loss, logits))

    ref_loss, ref_logits = reference_forward(emb1, emb2, mask1, mask2,
                                             weight, bias, labels)
    assert jnp.allclose(logits, ref_logits, atol=1e-4, rtol=1e-4), "logits mismatch"
    assert jnp.allclose(loss, ref_loss, atol=1e-4, rtol=1e-4), "loss mismatch"

    print("KERNEL_OK")
</pallas_src>

<mosaic_0001>
module attributes {stable_mosaic.version = 11 : i64} {
  func.func @_siamese_kernel(%arg0: i32, %arg1: i32, %arg2: memref<8x256x128xbf16, #tpu.memory_space<vmem>>, %arg3: memref<8x256x128xbf16, #tpu.memory_space<vmem>>, %arg4: memref<8x256xbf16, #tpu.memory_space<vmem>>, %arg5: memref<8x256xbf16, #tpu.memory_space<vmem>>, %arg6: memref<2x128xf32, #tpu.memory_space<vmem>>, %arg7: memref<2x128xf32, #tpu.memory_space<vmem>>, %arg8: memref<1x2xf32, #tpu.memory_space<vmem>>, %arg9: memref<8x1xi32, #tpu.memory_space<vmem>>, %arg10: memref<8x2xf32, #tpu.memory_space<vmem>>, %arg11: memref<8x1xf32, #tpu.memory_space<vmem>>, %arg12: memref<8x128xf32, #tpu.memory_space<vmem>>, %arg13: memref<8x128xf32, #tpu.memory_space<vmem>>, %arg14: memref<8x1xf32, #tpu.memory_space<vmem>>, %arg15: memref<8x1xf32, #tpu.memory_space<vmem>>) attributes {dimension_semantics = [#tpu.dimension_semantics<parallel>, #tpu.dimension_semantics<arbitrary>], iteration_bounds = array<i64: 2, 2>, scalar_prefetch = 0 : i64, scratch_operands = 4 : i64, tpu.core_type = #tpu.core_type<tc>, window_params = [{transform_indices = @transform_0, window_bounds = array<i64: 8, 256, 128>}, {transform_indices = @transform_1, window_bounds = array<i64: 8, 256, 128>}, {transform_indices = @transform_2, window_bounds = array<i64: 8, 256>}, {transform_indices = @transform_3, window_bounds = array<i64: 8, 256>}, {pipeline_mode = #tpu.pipeline_mode<synchronous>, transform_indices = @transform_4, window_bounds = array<i64: 2, 128>}, {pipeline_mode = #tpu.pipeline_mode<synchronous>, transform_indices = @transform_5, window_bounds = array<i64: 2, 128>}, {pipeline_mode = #tpu.pipeline_mode<synchronous>, transform_indices = @transform_6, window_bounds = array<i64: 1, 2>}, {transform_indices = @transform_7, window_bounds = array<i64: 8, 1>}, {transform_indices = @transform_8, window_bounds = array<i64: 8, 2>}, {transform_indices = @transform_9, window_bounds = array<i64: 8, 1>}]} {
    %c0_i32 = arith.constant 0 : i32
    %0 = arith.cmpi eq, %arg1, %c0_i32 : i32
    %1 = arith.extui %0 : i1 to i32
    %c0_i32_0 = arith.constant 0 : i32
    %2 = arith.cmpi ne, %1, %c0_i32_0 : i32
    scf.if %2 {
      %cst_30 = arith.constant 0.000000e+00 : f32
      %34 = vector.broadcast %cst_30 : f32 to vector<8x128xf32>
      %c0_31 = arith.constant 0 : index
      %c0_32 = arith.constant 0 : index
      %35 = vector.load %arg12[%c0_31, %c0_32] : memref<8x128xf32, #tpu.memory_space<vmem>>, vector<8x128xf32>
      tpu.vector_store %arg12[%c0_31, %c0_32], %34 {strides = array<i32>} : memref<8x128xf32, #tpu.memory_space<vmem>>, vector<8x128xf32>,
      %cst_33 = arith.constant 0.000000e+00 : f32
      %36 = vector.broadcast %cst_33 : f32 to vector<8x128xf32>
      %c0_34 = arith.constant 0 : index
      %c0_35 = arith.constant 0 : index
      %37 = vector.load %arg13[%c0_34, %c0_35] : memref<8x128xf32, #tpu.memory_space<vmem>>, vector<8x128xf32>
      tpu.vector_store %arg13[%c0_34, %c0_35], %36 {strides = array<i32>} : memref<8x128xf32, #tpu.memory_space<vmem>>, vector<8x128xf32>,
      %cst_36 = arith.constant 0.000000e+00 : f32
      %38 = vector.broadcast %cst_36 : f32 to vector<8x1xf32>
      %c0_37 = arith.constant 0 : index
      %c0_38 = arith.constant 0 : index
      %39 = vector.load %arg14[%c0_37, %c0_38] : memref<8x1xf32, #tpu.memory_space<vmem>>, vector<8x1xf32>
      tpu.vector_store %arg14[%c0_37, %c0_38], %38 {strides = array<i32>} : memref<8x1xf32, #tpu.memory_space<vmem>>, vector<8x1xf32>,
      %cst_39 = arith.constant 0.000000e+00 : f32
      %40 = vector.broadcast %cst_39 : f32 to vector<8x1xf32>
      %c0_40 = arith.constant 0 : index
      %c0_41 = arith.constant 0 : index
      %41 = vector.load %arg15[%c0_40, %c0_41] : memref<8x1xf32, #tpu.memory_space<vmem>>, vector<8x1xf32>
      tpu.vector_store %arg15[%c0_40, %c0_41], %40 {strides = array<i32>} : memref<8x1xf32, #tpu.memory_space<vmem>>, vector<8x1xf32>,
    } else {
    }
    %c0 = arith.constant 0 : index
    %c0_1 = arith.constant 0 : index
    %3 = vector.load %arg4[%c0, %c0_1] : memref<8x256xbf16, #tpu.memory_space<vmem>>, vector<8x256xbf16>
    %c0_2 = arith.constant 0 : index
    %c0_3 = arith.constant 0 : index
    %4 = vector.load %arg5[%c0_2, %c0_3] : memref<8x256xbf16, #tpu.memory_space<vmem>>, vector<8x256xbf16>
    %c0_4 = arith.constant 0 : index
    %c0_5 = arith.constant 0 : index
    %5 = vector.load %arg12[%c0_4, %c0_5] : memref<8x128xf32, #tpu.memory_space<vmem>>, vector<8x128xf32>
    %6 = vector.shape_cast %3 : vector<8x256xbf16> to vector<8x1x256xbf16>
    %c0_6 = arith.constant 0 : index
    %c0_7 = arith.constant 0 : index
    %c0_8 = arith.constant 0 : index
    %7 = vector.load %arg2[%c0_6, %c0_7, %c0_8] : memref<8x256x128xbf16, #tpu.memory_space<vmem>>, vector<8x256x128xbf16>
    "tpu.trace_start"() <{level = 10 : i32, message = "bks,bsh->bkh"}> : () -> ()
    %cst = arith.constant dense<0.000000e+00> : vector<8x1x128xf32>
    %8 = tpu.matmul %6, %7, %cst {dimension_numbers = #tpu.dot_dimension_numbers<[2], [1], [1], [2], [0, 0, 0, 1, 1, 2], [0], [0]>} : vector<8x1x256xbf16>, vector<8x256x128xbf16>, vector<8x1x128xf32> -> vector<8x1x128xf32>
    "tpu.trace_stop"() : () -> ()
    %9 = vector.shape_cast %8 : vector<8x1x128xf32> to vector<8x128xf32>
    %10 = arith.addf %5, %9 : vector<8x128xf32>
    %c0_9 = arith.constant 0 : index
    %c0_10 = arith.constant 0 : index
    %11 = vector.load %arg12[%c0_9, %c0_10] : memref<8x128xf32, #tpu.memory_space<vmem>>, vector<8x128xf32>
    tpu.vector_store %arg12[%c0_9, %c0_10], %10 {strides = array<i32>} : memref<8x128xf32, #tpu.memory_space<vmem>>, vector<8x128xf32>,
    %c0_11 = arith.constant 0 : index
    %c0_12 = arith.constant 0 : index
    %12 = vector.load %arg13[%c0_11, %c0_12] : memref<8x128xf32, #tpu.memory_space<vmem>>, vector<8x128xf32>
    %13 = vector.shape_cast %4 : vector<8x256xbf16> to vector<8x1x256xbf16>
    %c0_13 = arith.constant 0 : index
    %c0_14 = arith.constant 0 : index
    %c0_15 = arith.constant 0 : index
    %14 = vector.load %arg3[%c0_13, %c0_14, %c0_15] : memref<8x256x128xbf16, #tpu.memory_space<vmem>>, vector<8x256x128xbf16>
    "tpu.trace_start"() <{level = 10 : i32, message = "bks,bsh->bkh"}> : () -> ()
    %cst_16 = arith.constant dense<0.000000e+00> : vector<8x1x128xf32>
    %15 = tpu.matmul %13, %14, %cst_16 {dimension_numbers = #tpu.dot_dimension_numbers<[2], [1], [1], [2], [0, 0, 0, 1, 1, 2], [0], [0]>} : vector<8x1x256xbf16>, vector<8x256x128xbf16>, vector<8x1x128xf32> -> vector<8x1x128xf32>
    "tpu.trace_stop"() : () -> ()
    %16 = vector.shape_cast %15 : vector<8x1x128xf32> to vector<8x128xf32>
    %17 = arith.addf %12, %16 : vector<8x128xf32>
    %c0_17 = arith.constant 0 : index
    %c0_18 = arith.constant 0 : index
    %18 = vector.load %arg13[%c0_17, %c0_18] : memref<8x128xf32, #tpu.memory_space<vmem>>, vector<8x128xf32>
    tpu.vector_store %arg13[%c0_17, %c0_18], %17 {strides = array<i32>} : memref<8x128xf32, #tpu.memory_space<vmem>>, vector<8x128xf32>,
    %c0_19 = arith.constant 0 : index
    %c0_20 = arith.constant 0 : index
    %19 = vector.load %arg14[%c0_19, %c0_20] : memref<8x1xf32, #tpu.memory_space<vmem>>, vector<8x1xf32>
    %20 = arith.extf %3 : vector<8x256xbf16> to vector<8x256xf32>
    %cst_21 = arith.constant dense<0.000000e+00> : vector<8xf32>
    %21 = vector.multi_reduction <add>, %20, %cst_21 [1] : vector<8x256xf32> to vector<8xf32>
    %22 = vector.shape_cast %21 : vector<8xf32> to vector<8x1xf32>
    %23 = arith.addf %19, %22 : vector<8x1xf32>
    %c0_22 = arith.constant 0 : index
    %c0_23 = arith.constant 0 : index
    %24 = vector.load %arg14[%c0_22, %c0_23] : memref<8x1xf32, #tpu.memory_space<vmem>>, vector<8x1xf32>
    tpu.vector_store %arg14[%c0_22, %c0_23], %23 {strides = array<i32>} : memref<8x1xf32, #tpu.memory_space<vmem>>, vector<8x1xf32>,
    %c0_24 = arith.constant 0 : index
    %c0_25 = arith.constant 0 : index
    %25 = vector.load %arg15[%c0_24, %c0_25] : memref<8x1xf32, #tpu.memory_space<vmem>>, vector<8x1xf32>
    %26 = arith.extf %4 : vector<8x256xbf16> to vector<8x256xf32>
    %cst_26 = arith.constant dense<0.000000e+00> : vector<8xf32>
    %27 = vector.multi_reduction <add>, %26, %cst_26 [1] : vector<8x256xf32> to vector<8xf32>
    %28 = vector.shape_cast %27 : vector<8xf32> to vector<8x1xf32>
    %29 = arith.addf %25, %28 : vector<8x1xf32>
    %c0_27 = arith.constant 0 : index
    %c0_28 = arith.constant 0 : index
    %30 = vector.load %arg15[%c0_27, %c0_28] : memref<8x1xf32, #tpu.memory_space<vmem>>, vector<8x1xf32>
    tpu.vector_store %arg15[%c0_27, %c0_28], %29 {strides = array<i32>} : memref<8x1xf32, #tpu.memory_space<vmem>>, vector<8x1xf32>,
    %c1_i32 = arith.constant 1 : i32
    %31 = arith.cmpi eq, %arg1, %c1_i32 : i32
    %32 = arith.extui %31 : i1 to i32
    %c0_i32_29 = arith.constant 0 : i32
    %33 = arith.cmpi ne, %32, %c0_i32_29 : i32
    scf.if %33 {
      %c0_30 = arith.constant 0 : index
      %c0_31 = arith.constant 0 : index
      %34 = vector.load %arg12[%c0_30, %c0_31] : memref<8x128xf32, #tpu.memory_space<vmem>>, vector<8x128xf32>
      %c0_32 = arith.constant 0 : index
      %c0_33 = arith.constant 0 : index
      %35 = vector.load %arg14[%c0_32, %c0_33] : memref<8x1xf32, #tpu.memory_space<vmem>>, vector<8x1xf32>
      %cst_34 = arith.constant 9.99999971E-10 : f32
      %36 = vector.broadcast %cst_34 : f32 to vector<8x1xf32>
      %37 = arith.maximumf %35, %36 : vector<8x1xf32>
      %38 = vector.broadcast %37 : vector<8x1xf32> to vector<8x128xf32>
      %39 = arith.divf %34, %38 : vector<8x128xf32>
      %c0_35 = arith.constant 0 : index
      %c0_36 = arith.constant 0 : index
      %40 = vector.load %arg13[%c0_35, %c0_36] : memref<8x128xf32, #tpu.memory_space<vmem>>, vector<8x128xf32>
      %c0_37 = arith.constant 0 : index
      %c0_38 = arith.constant 0 : index
      %41 = vector.load %arg15[%c0_37, %c0_38] : memref<8x1xf32, #tpu.memory_space<vmem>>, vector<8x1xf32>
      %cst_39 = arith.constant 9.99999971E-10 : f32
      %42 = vector.broadcast %cst_39 : f32 to vector<8x1xf32>
      %43 = arith.maximumf %41, %42 : vector<8x1xf32>
      %44 = vector.broadcast %43 : vector<8x1xf32> to vector<8x128xf32>
      %45 = arith.divf %40, %44 : vector<8x128xf32>
      %c0_40 = arith.constant 0 : index
      %c0_41 = arith.constant 0 : index
      %46 = vector.load %arg6[%c0_40, %c0_41] : memref<2x128xf32, #tpu.memory_space<vmem>>, vector<2x128xf32>
      %cst_42 = arith.constant dense<0.000000e+00> : vector<8x2xf32>
      %47 = tpu.matmul %39, %46, %cst_42 {dimension_numbers = #tpu.dot_dimension_numbers<[1], [1], [0], [0], [0, 0, 1, 0], [], []>} : vector<8x128xf32>, vector<2x128xf32>, vector<8x2xf32> -> vector<8x2xf32>
      %c0_43 = arith.constant 0 : index
      %c0_44 = arith.constant 0 : index
      %48 = vector.load %arg7[%c0_43, %c0_44] : memref<2x128xf32, #tpu.memory_space<vmem>>, vector<2x128xf32>
      %cst_45 = arith.constant dense<0.000000e+00> : vector<8x2xf32>
      %49 = tpu.matmul %45, %48, %cst_45 {dimension_numbers = #tpu.dot_dimension_numbers<[1], [1], [0], [0], [0, 0, 1, 0], [], []>} : vector<8x128xf32>, vector<2x128xf32>, vector<8x2xf32> -> vector<8x2xf32>
      %50 = arith.addf %47, %49 : vector<8x2xf32>
      %c0_46 = arith.constant 0 : index
      %c0_47 = arith.constant 0 : index
      %51 = vector.load %arg8[%c0_46, %c0_47] : memref<1x2xf32, #tpu.memory_space<vmem>>, vector<1x2xf32>
      %52 = vector.broadcast %51 : vector<1x2xf32> to vector<8x2xf32>
      %53 = arith.addf %50, %52 : vector<8x2xf32>
      %c0_48 = arith.constant 0 : index
      %c0_49 = arith.constant 0 : index
      %54 = vector.load %arg10[%c0_48, %c0_49] : memref<8x2xf32, #tpu.memory_space<vmem>>, vector<8x2xf32>
      tpu.vector_store %arg10[%c0_48, %c0_49], %53 {strides = array<i32>} : memref<8x2xf32, #tpu.memory_space<vmem>>, vector<8x2xf32>,
      %cst_50 = arith.constant dense<0xFF800000> : vector<8xf32>
      %55 = vector.multi_reduction <maximumf>, %53, %cst_50 [1] : vector<8x2xf32> to vector<8xf32>
      %56 = vector.shape_cast %55 : vector<8xf32> to vector<8x1xf32>
      %57 = vector.broadcast %56 : vector<8x1xf32> to vector<8x2xf32>
      %58 = arith.subf %53, %57 : vector<8x2xf32>
      %59 = math.exp %58 : vector<8x2xf32>
      %cst_51 = arith.constant dense<0.000000e+00> : vector<8xf32>
      %60 = vector.multi_reduction <add>, %59, %cst_51 [1] : vector<8x2xf32> to vector<8xf32>
      %61 = vector.shape_cast %60 : vector<8xf32> to vector<8x1xf32>
      %62 = math.log %61 : vector<8x1xf32>
      %63 = arith.addf %56, %62 : vector<8x1xf32>
      %c0_52 = arith.constant 0 : index
      %c0_53 = arith.constant 0 : index
      %64 = vector.load %arg9[%c0_52, %c0_53] : memref<8x1xi32, #tpu.memory_space<vmem>>, vector<8x1xi32>
      %65 = tpu.iota {dimensions = array<i32: 1>} : vector<8x2xi32>
      %66 = vector.broadcast %64 : vector<8x1xi32> to vector<8x2xi32>
      %67 = arith.cmpi eq, %65, %66 : vector<8x2xi32>
      %68 = arith.extui %67 : vector<8x2xi1> to vector<8x2xi32>
      %69 = arith.sitofp %68 : vector<8x2xi32> to vector<8x2xf32>
      %70 = arith.mulf %53, %69 : vector<8x2xf32>
      %cst_54 = arith.constant dense<0.000000e+00> : vector<8xf32>
      %71 = vector.multi_reduction <add>, %70, %cst_54 [1] : vector<8x2xf32> to vector<8xf32>
      %72 = vector.shape_cast %71 : vector<8xf32> to vector<8x1xf32>
      %73 = arith.subf %63, %72 : vector<8x1xf32>
      %c0_55 = arith.constant 0 : index
      %c0_56 = arith.constant 0 : index
      %74 = vector.load %arg11[%c0_55, %c0_56] : memref<8x1xf32, #tpu.memory_space<vmem>>, vector<8x1xf32>
      tpu.vector_store %arg11[%c0_55, %c0_56], %73 {strides = array<i32>} : memref<8x1xf32, #tpu.memory_space<vmem>>, vector<8x1xf32>,
    } else {
    }
    return
  }
  func.func @transform_0(%arg0: i32, %arg1: i32) -> (i32, i32, i32) {
    %c0_i32 = arith.constant 0 : i32
    %c0_i32_0 = arith.constant 0 : i32
    return %arg0, %arg1, %c0_i32 : i32, i32, i32
  }
  func.func @transform_1(%arg0: i32, %arg1: i32) -> (i32, i32, i32) {
    %c0_i32 = arith.constant 0 : i32
    %c0_i32_0 = arith.constant 0 : i32
    return %arg0, %arg1, %c0_i32 : i32, i32, i32
  }
  func.func @transform_2(%arg0: i32, %arg1: i32) -> (i32, i32) {
    %c0_i32 = arith.constant 0 : i32
    return %arg0, %arg1 : i32, i32
  }
  func.func @transform_3(%arg0: i32, %arg1: i32) -> (i32, i32) {
    %c0_i32 = arith.constant 0 : i32
    return %arg0, %arg1 : i32, i32
  }
  func.func @transform_4(%arg0: i32, %arg1: i32) -> (i32, i32) {
    %c0_i32 = arith.constant 0 : i32
    %c0_i32_0 = arith.constant 0 : i32
    %c0_i32_1 = arith.constant 0 : i32
    return %c0_i32, %c0_i32_0 : i32, i32
  }
  func.func @transform_5(%arg0: i32, %arg1: i32) -> (i32, i32) {
    %c0_i32 = arith.constant 0 : i32
    %c0_i32_0 = arith.constant 0 : i32
    %c0_i32_1 = arith.constant 0 : i32
    return %c0_i32, %c0_i32_0 : i32, i32
  }
  func.func @transform_6(%arg0: i32, %arg1: i32) -> (i32, i32) {
    %c0_i32 = arith.constant 0 : i32
    %c0_i32_0 = arith.constant 0 : i32
    %c0_i32_1 = arith.constant 0 : i32
    return %c0_i32, %c0_i32_0 : i32, i32
  }
  func.func @transform_7(%arg0: i32, %arg1: i32) -> (i32, i32) {
    %c0_i32 = arith.constant 0 : i32
    %c0_i32_0 = arith.constant 0 : i32
    return %arg0, %c0_i32 : i32, i32
  }
  func.func @transform_8(%arg0: i32, %arg1: i32) -> (i32, i32) {
    %c0_i32 = arith.constant 0 : i32
    %c0_i32_0 = arith.constant 0 : i32
    return %arg0, %c0_i32 : i32, i32
  }
  func.func @transform_9(%arg0: i32, %arg1: i32) -> (i32, i32) {
    %c0_i32 = arith.constant 0 : i32
    %c0_i32_0 = arith.constant 0 : i32
    return %arg0, %c0_i32 : i32, i32
  }
}

</mosaic_0001>

<bundles_post_ra>
// kernel: tpu_custom_call.1
= control target key start
LH: loop header
LB: loop body
LE: loop exit
PB: predicated region body
PF: predicated region fallthrough
CT: control target
= control target key end

     0   :  { %s6191_s0 = inlined_call_operand.hbm [shape: bf16[16,512,128], index: 0, kind: input, shape index: {}]   ;;  %s6192_s1 = inlined_call_operand.hbm [shape: bf16[16,512,128], index: 1, kind: input, shape index: {}]   ;;  %s6193_s2 = inlined_call_operand.hbm [shape: bf16[16,512], index: 2, kind: input, shape index: {}]   ;;  %s6194_s3 = inlined_call_operand.hbm [shape: bf16[16,512], index: 3, kind: input, shape index: {}]   ;;  %s6195_s4 = inlined_call_operand.hbm [shape: f32[2,128], index: 4, kind: input, shape index: {}]   ;;  %s6196_s5 = inlined_call_operand.hbm [shape: f32[2,128], index: 5, kind: input, shape index: {}]   ;;  %s6197_s6 = inlined_call_operand.hbm [shape: f32[1,2], index: 6, kind: input, shape index: {}]   ;;  %s6198_s7 = inlined_call_operand.vmem [shape: s32[16,1], index: 7, kind: input, shape index: {}]   ;;  %s6199_s8 = inlined_call_operand.vmem [shape: f32[16,2], index: 8, kind: output, shape index: {0}]   ;;  %s6200_s9 = inlined_call_operand.vmem [shape: f32[16,1], index: 9, kind: output, shape index: {1}]  }
   0x1   :  { %6211 = sst [smem:[#allocation32_spill]] %s6191_s0 }
   0x2   :  { %6212 = sst [smem:[#allocation33_spill]] %s6192_s1 }
   0x3   :  { %6213 = sst [smem:[#allocation34_spill]] %s6196_s5 }
   0x4   :  { %6214 = sst [smem:[#allocation35_spill]] %s6199_s8 }
   0x5   :  { %6215 = sst [smem:[#allocation36_spill]] %s6200_s9 }
   0x6   :  { %15 = vsyncpa [#allocation7], 0 }
   0x7   :  { %17 = vsyncpa [#allocation7 + $0x1], 0 }
   0x8   :  { %18 = vsyncpa [#allocation9], 0 }
   0x9   :  { %20 = vsyncpa [#allocation9 + $0x1], 0 }
   0xa   :  { %21 = vsyncpa [#allocation12], 0 }
   0xb   :  { %23 = vsyncpa [#allocation12 + $0x1], 0 }
   0xc   :  { %24 = vsyncpa [#allocation15], 0  ;;  %s5437_s30 = smov 0   ;;  %s5439_s10 = smov 0  }
   0xd   :  { %s5441_s11 = smov 0   ;;  %s5443_s12 = smov 0  }
   0xe   :  { %s5445_s13 = smov 0   ;;  %s5447_s14 = smov 0  }
   0xf   :  { %s5449_s15 = smov 0   ;;  %s5451_s16 = smov 0  }
  0x10 LB: > { %6216 = sst [smem:[#allocation28_spill]] %s5347_s12  ;;  %s6201_s17 = sadd.s32 4294967295, %s5363_s16   ;;  %s5363_s16 = sphi %s5451_s16, %s30_s16   ;;  %s5359_s15 = sphi %s5449_s15, %s6251_s15   ;;  %s5355_s14 = sphi %s5447_s14, %s6250_s14   ;;  %s5351_s13 = sphi %s5445_s13, %s6249_s13   ;;  %s5347_s12 = sphi %s5443_s12, %s6248_s12   ;;  %s5343_s11 = sphi %s5441_s11, %s6247_s11   ;;  %s5339_s10 = sphi %s5439_s10, %s6246_s10   ;;  %s5335_s30 = sphi %s5437_s30, %s6245_s30  }
  0x11   : > { %s39_s18 = sadd.s32 1, %s5355_s14  ;;  %s42_s19 = sadd.s32 1, %s5359_s15 }
  0x12   : > { %p40_p0 = scmp.ge.s32.totalorder %s39_s18, 2  ;;  %s51_s20 = sadd.s32 1, %s5343_s11 }
  0x13   : > { %p58_p1 = scmp.ne.s32.totalorder %s5343_s11, %s5339_s10  ;;  %p59_p2 = scmp.eq.s32.totalorder %s5363_s16, 0 }
  0x14   : > { %s6253_s18 = smov (%p40_p0, %s39_s18), 0  ;;  %s6255_s19 = smov (!%p40_p0, %s42_s19), %s5359_s15 }
  0x15   : > { %6217 = sst [smem:[#allocation29_spill]] %s6253_s18  ;;  %s47_s21 = ssub.s32 %s5355_s14, %s6253_s18 }
  0x16   : > { %p44_p3 = scmp.ge.s32.totalorder %s6255_s19, 2  ;;  %p64_p4 = scmp.ne.s32.totalorder %s5339_s10, %s5335_s30 }
  0x17   : > { %p5488_p5 = por %p59_p2, %p58_p1  ;;  %p5494_p6 = scmp.eq.s32.totalorder %s6201_s17, 0 }
  0x18   : > { %s6257_s19 = smov (%p44_p3, %s6255_s19), 0  ;;  %p4063_p8 = scmp.ge.s32.totalorder %s5363_s16, 1 }
  0x19   : > { %s6218_s22 = scalar_select %p5488_p5, 1, 0 }
  0x1a   : > { %s6219_s23 = scalar_select %p5494_p6, 1, 0 }
  0x1b   : > { %6220 = sst [smem:[#allocation30_spill]] %s6257_s19  ;;  %p5502_p7 = por %p5494_p6, %p64_p4 }
  0x1c   : > { %s46_s25 = ssub.s32 %s5359_s15, %s6257_s19  ;;  %p300_p9 = scmp.lt.s32.totalorder %s5363_s16, 5 }
  0x1d   : > { %s6221_s24 = scalar_select %p5502_p7, 1, 0 }
  0x1e   : > { %s48_s26 = sor.u32 %s47_s21, %s46_s25  ;;  %p5510_p11 = pnand %p4063_p8, %p300_p9 }
  0x1f   : > { %p49_p10 = scmp.eq.s32.totalorder %s48_s26, 0  ;;  %s5365_s29 = smov [#allocation14]  }
  0x20   : > { %s6222_s27 = scalar_select %p5510_p11, 1, 0 }
  0x21   : > { %s5515_s28 = scalar_select %p49_p10, %s5343_s11, %s51_s20  }
  0x22   : > { %p4773_p12 = pneg %p5510_p11  ;;  %s324_s30 = sshll.u32 %s5365_s29, 4  ;;  %s325_s30 = int_to_ptr.vmem [resolvable:$true] %s324_s30 }
  0x23   : > { %6223 = sst [smem:[#allocation31_spill]] %s5515_s28  ;;  %s5366_s21 = smov [#allocation13]  }
  0x24   : > { %p5521_p13 = pnand %p4773_p12, %p5494_p6  ;;  %s313_s25 = sshll.u32 %s5366_s21, 4  ;;  %s314_s25 = int_to_ptr.vmem [resolvable:$true] %s313_s25 }
  0x25   : > { %s6225_s5 = sld [smem:[#allocation34_spill]] }
  0x26   : > { %p5533_p1 = pneg %p5521_p13 }
  0x2b   : > { %s5141_s18 = scalar_lea.hbm %s6225_s5, 32 }
  0x2c   : > { %p5142_p0 = scmp.ne.s32.totalorder %s6225_s5, %s5141_s18  ;;  %p5148_p4 = scmp.lt.u32.totalorder %s5141_s18, %s6225_s5 }
  0x2e   : > { %p5144_p2 = pnand %p5533_p1, %p5142_p0 }
  0x30   : > { %p5145_p3 = pneg %p5144_p2 }
  0x32   : > { %p5150_p8 = pnand %p5148_p4, %p5145_p3 }
  0x34   : > { %5153 = shalt.err (!%p5150_p8)
}
  0x35   : > { %s5154_s19 = scalar_lea.vmem %s325_s30, 32  ;;  %p5162_p6 = scmp.lt.s32.totalorder %s325_s30, %s325_s30 }
  0x36   : > { %p5155_p9 = scmp.ne.s32.totalorder %s325_s30, %s5154_s19  ;;  %p5163_p7 = scmp.lt.s32.totalorder %s5154_s19, %s5154_s19 }
  0x38   : > { %p5157_p10 = pnand %p5155_p9, %p5533_p1  ;;  %p5164_p11 = por %p5163_p7, %p5162_p6 }
  0x3a   : > { %p5158_p12 = pneg %p5157_p10 }
  0x3c   : > { %p5165_p5 = pnand %p5164_p11, %p5158_p12 }
  0x3e   : > { %5168 = shalt.err (!%p5165_p5)
}
  0x3f   : > { %4779 = dma.hbm_to_vmem [thread:$0]  (!%p5521_p13), %s6225_s5, 32, %s325_s30, [#allocation15]  }
  0x40   : > { %s5169_s28 = scalar_lea.hbm %s6195_s4, 32 }
  0x41   : > { %p5170_p0 = scmp.ne.s32.totalorder %s6195_s4, %s5169_s28  ;;  %p5176_p5 = scmp.lt.u32.totalorder %s5169_s28, %s6195_s4 }
  0x43   : > { %p5172_p6 = pnand %p5170_p0, %p5533_p1 }
  0x45   : > { %p5173_p7 = pneg %p5172_p6 }
  0x47   : > { %p5178_p11 = pnand %p5176_p5, %p5173_p7 }
  0x49   : > { %5181 = shalt.err (!%p5178_p11)
}
  0x4a   : > { %s5182_s12 = scalar_lea.vmem %s314_s25, 32  ;;  %p5190_p8 = scmp.lt.s32.totalorder %s314_s25, %s314_s25 }
  0x4b   : > { %p5183_p2 = scmp.ne.s32.totalorder %s314_s25, %s5182_s12  ;;  %p5191_p9 = scmp.lt.s32.totalorder %s5182_s12, %s5182_s12 }
  0x4d   : > { %p5185_p3 = pnand %p5183_p2, %p5533_p1  ;;  %p5192_p10 = por %p5191_p9, %p5190_p8 }
  0x4f   : > { %p5186_p4 = pneg %p5185_p3 }
  0x51   : > { %p5193_p12 = pnand %p5192_p10, %p5186_p4 }
  0x53   : > { %5196 = shalt.err (!%p5193_p12)
}
  0x54   : > { %4776 = dma.hbm_to_vmem [thread:$0]  (!%p5521_p13), %s6195_s4, 32, %s314_s25, [#allocation12]  }
  0x55   : > { %s5367_s8 = smov [#allocation16]   ;;  %s5197_s26 = scalar_lea.hbm %s6197_s6, 16 }
  0x56   : > { %s335_s9 = sshll.u32 %s5367_s8, 4  ;;  %p5198_p0 = scmp.ne.s32.totalorder %s6197_s6, %s5197_s26  ;;  %s336_s9 = int_to_ptr.vmem [resolvable:$true] %s335_s9 }
  0x57   : > { %p5204_p5 = scmp.lt.u32.totalorder %s5197_s26, %s6197_s6 }
  0x58   : > { %p5200_p6 = pnand %p5198_p0, %p5533_p1 }
  0x5a   : > { %p5201_p7 = pneg %p5200_p6 }
  0x5c   : > { %p5206_p11 = pnand %p5204_p5, %p5201_p7 }
  0x5e   : > { %5209 = shalt.err (!%p5206_p11)
}
  0x5f   : > { %s5210_s25 = scalar_lea.vmem %s336_s9, 16  ;;  %s5217_s30 = scalar_lea.vmem %s336_s9, 32 }
  0x60   : > { %p5211_p2 = scmp.ne.s32.totalorder %s336_s9, %s5210_s25  ;;  %p5218_p8 = scmp.lt.s32.totalorder %s336_s9, %s336_s9 }
  0x61   : > { %p5219_p9 = scmp.lt.s32.totalorder %s5217_s30, %s5210_s25 }
  0x62   : > { %p5213_p3 = pnand %p5211_p2, %p5533_p1 }
  0x63   : > { %p5220_p10 = por %p5219_p9, %p5218_p8 }
  0x64   : > { %p5214_p4 = pneg %p5213_p3 }
  0x66   : > { %p5221_p12 = pnand %p5220_p10, %p5214_p4 }
  0x68   : > { %5224 = shalt.err (!%p5221_p12)
}
  0x69   : > { %4782 = dma.hbm_to_vmem [thread:$0]  (!%p5521_p13), %s6197_s6, 16, %s336_s9, [#allocation15]  }
  0x6a   : > { %p4067_p0 = scmp.ge.s32.totalorder %s5363_s16, 4 }
  0x6c   : > { %342 = sbr.rel (%p4067_p0) target bundleno = 195 (0xc3), region = 28 }
  0x73   : > { %s5587_s5 = sand.u32 1, %s5343_s11   ;;  %s4070_s29 = sshll.u32 %s5355_s14, 5 }
  0x74   : > { %s6209_s17 = sshll.u32 %s5587_s5, 10  ;;  %s4371_s18 = sshll.u32 %s5359_s15, 9 }
  0x75   : > { %s357_s28 = sadd.s32 %s4371_s18, %s4070_s29  ;;  %s350_s9 = scalar_lea.vmem [#allocation6], %s6209_s17 }
  0x76   : > { %s372_s26 = sshll.u32 %s350_s9, 4  ;;  %s4072_s20 = sshll.u32 %s357_s28, 6  ;;  %s373_s26 = int_to_ptr.vmem [resolvable:$true] %s372_s26 }
  0x77   : > { %p6227_p13 = scmp.ne.s32.totalorder %s6218_s22, 0  ;;  %s5368_s12 = smov 4096  }
  0x78   : > { %s5369_s30 = smov 2048   ;;  %s5370_s21 = smov 32  }
  0x79   : > { %s4745_s19 = scalar_select %p6227_p13, [#allocation0], [#allocation21] }
  0x7a   : > { %4746 = sst [smem:[#allocation18]] (%p6227_p13), %s5368_s12  ;;  %s5371_s8 = smov 64  }
  0x7b   : > { %s364_s25 = sld [smem:[%s4745_s19]]   ;;  %s5372_s9 = smov 4  }
  0x7c   : > { %4747 = sst [smem:[#allocation18 + $0x1]] (%p6227_p13), %s5369_s30  ;;  %s6228_s0 = sld [smem:[#allocation32_spill]] }
  0x7d   : > { %4748 = sst [smem:[#allocation18 + $0x2]] (%p6227_p13), %s5370_s21  ;;  %s347_s17 = scalar_lea.sflag [#allocation7], %s5587_s5 }
  0x7e   : > { %4749 = sst [smem:[#allocation18 + $0x3]] (%p6227_p13), %s5371_s8  ;;  %s5373_s30 = smov [#allocation17]  }
  0x7f   : > { %4750 = sst [smem:[#allocation18 + $0x4]] (%p6227_p13), %s5371_s8 }
  0x80   : > { %4751 = sst [smem:[#allocation18 + $0x5]] (%p6227_p13), %s5372_s9 }
  0x81   : > { %s4073_s19 = sshll.u32 %s364_s25, 26 }
  0x82   : > { %s359_s28 = scalar_lea.hbm %s6228_s0, %s4072_s20  ;;  %s4074_s12 = sadd.s32 134217728, %s4073_s19 }
  0x83   : > { %4752 = dma.general (%p6227_p13), %s359_s28, 16384, %s373_s26, %s347_s17, %s5373_s30, [#allocation18], %s4074_s12, 0  }
  0x84   : > { %s6210_s21 = sand.u32 1, %s5363_s16   ;;  %s6229_s1 = sld [smem:[#allocation33_spill]] }
  0x85   : > { %s4753_s25 = scalar_select %p6227_p13, [#allocation0], [#allocation22] }
  0x86   : > { %s6230_s9 = sshll.u32 %s5587_s5, 10  ;;  %s5374_s26 = smov 4096  }
  0x87   : > { %s399_s19 = scalar_lea.vmem [#allocation8], %s6230_s9  ;;  %s413_s17 = sld [smem:[%s4753_s25]]  }
  0x88   : > { %s421_s0 = sshll.u32 %s399_s19, 4  ;;  %4754 = sst [smem:[#allocation20]] (%p6227_p13), %s5374_s26  ;;  %s422_s0 = int_to_ptr.vmem [resolvable:$true] %s421_s0 }
  0x89   : > { %s5375_s28 = smov 2048   ;;  %s5376_s12 = smov 32  }
  0x8a   : > { %s408_s18 = scalar_lea.hbm %s6229_s1, %s4072_s20  ;;  %4755 = sst [smem:[#allocation20 + $0x1]] (%p6227_p13), %s5375_s28 }
  0x8b   : > { %4756 = sst [smem:[#allocation20 + $0x2]] (%p6227_p13), %s5376_s12  ;;  %s5377_s20 = smov 64  }
  0x8c   : > { %4757 = sst [smem:[#allocation20 + $0x3]] (%p6227_p13), %s5377_s20  ;;  %s5378_s29 = smov 4  }
  0x8d   : > { %4758 = sst [smem:[#allocation20 + $0x4]] (%p6227_p13), %s5377_s20  ;;  %s4080_s30 = sshll.u32 %s413_s17, 26 }
  0x8e   : > { %4759 = sst [smem:[#allocation20 + $0x5]] (%p6227_p13), %s5378_s29  ;;  %s4081_s8 = sadd.s32 134217728, %s4080_s30 }
  0x8f   : > { %s5636_s25 = scalar_lea.sflag [#allocation9], %s6210_s21  ;;  %s5379_s9 = smov [#allocation19]  }
  0x90   : > { %4760 = dma.general (%p6227_p13), %s408_s18, 16384, %s422_s0, %s5636_s25, %s5379_s9, [#allocation20], %s4081_s8, 0  }
  0x91   : > { %s4082_s19 = sshll.u32 %s5587_s5, 3  ;;  %s4083_s26 = sshll.u32 %s5355_s14, 1 }
  0x92   : > { %s4084_s28 = sshll.u32 %s5359_s15, 2  ;;  %s448_s12 = scalar_lea.vmem [#allocation10], %s4082_s19 }
  0x93   : > { %s5644_s17 = sadd.s32 %s4084_s28, %s4083_s26  ;;  %s458_s20 = sshll.u32 %s448_s12, 4  ;;  %s459_s20 = int_to_ptr.vmem [resolvable:$true] %s458_s20 }
  0x94   : > { %s4085_s30 = sshll.u32 %s5644_s17, 6  ;;  %s5229_s28 = scalar_lea.hbm %s6193_s2, 512 }
  0x95   : > { %s456_s18 = scalar_lea.hbm %s6193_s2, %s4085_s30 }
  0x96   : > { %s5225_s8 = scalar_lea.hbm %s456_s18, 128  ;;  %p5230_p5 = scmp.lt.u32.totalorder %s456_s18, %s6193_s2 }
  0x97   : > { %p5226_p1 = scmp.ne.s32.totalorder %s456_s18, %s5225_s8  ;;  %p5231_p11 = scmp.lt.u32.totalorder %s5229_s28, %s5225_s8 }
  0x98   : > { %p5233_p3 = scmp.lt.u32.totalorder %s5225_s8, %s456_s18 }
  0x99   : > { %p5227_p6 = pnand %p5226_p1, %p6227_p13  ;;  %p5232_p2 = por %p5231_p11, %p5230_p5 }
  0x9b   : > { %p5228_p7 = pneg %p5227_p6  ;;  %p5234_p4 = por %p5233_p3, %p5232_p2 }
  0x9d   : > { %p5235_p8 = pnand %p5234_p4, %p5228_p7 }
  0x9f   : > { %5238 = shalt.err (!%p5235_p8)
}
  0xa0   : > { %s5239_s12 = scalar_lea.vmem %s459_s20, 128  ;;  %s5380_s29 = smov [#allocation10]  }
  0xa1   : > { %p5240_p9 = scmp.ne.s32.totalorder %s459_s20, %s5239_s12  ;;  %s5243_s0 = sshll.u32 %s5380_s29, 4  ;;  %s5244_s0 = int_to_ptr.vmem [resolvable:$false] %s5243_s0 }
  0xa2   : > { %s5245_s9 = scalar_lea.vmem %s5244_s0, 256  ;;  %p5246_p0 = scmp.lt.s32.totalorder %s459_s20, %s5244_s0 }
  0xa3   : > { %p5241_p10 = pnand %p5240_p9, %p6227_p13  ;;  %p5247_p1 = scmp.lt.s32.totalorder %s5245_s9, %s5239_s12 }
  0xa5   : > { %p5242_p12 = pneg %p5241_p10  ;;  %p5248_p6 = por %p5247_p1, %p5246_p0 }
  0xa7   : > { %p5249_p5 = pnand %p5248_p6, %p5242_p12 }
  0xa9   : > { %5252 = shalt.err (!%p5249_p5)
}
  0xaa   : > { %4761 = dma.hbm_to_vmem [thread:$0]  (%p6227_p13), %s456_s18, 128, %s459_s20, %s5636_s25  }
  0xab   : > { %s5672_s8 = scalar_lea.hbm %s6194_s3, %s4085_s30  ;;  %s469_s26 = scalar_lea.vmem [#allocation11], %s4082_s19 }
  0xac   : > { %s479_s28 = sshll.u32 %s469_s26, 4  ;;  %s6231_s12 = sand.u32 1, %s5363_s16   ;;  %s480_s28 = int_to_ptr.vmem [resolvable:$true] %s479_s28 }
  0xad   : > { %s466_s29 = scalar_lea.sflag [#allocation12], %s6231_s12  ;;  %s5253_s0 = scalar_lea.hbm %s5672_s8, 128 }
  0xae   : > { %p5254_p7 = scmp.ne.s32.totalorder %s5672_s8, %s5253_s0  ;;  %s5257_s20 = scalar_lea.hbm %s6194_s3, 512 }
  0xaf   : > { %p5258_p3 = scmp.lt.u32.totalorder %s5672_s8, %s6194_s3  ;;  %p5259_p4 = scmp.lt.u32.totalorder %s5257_s20, %s5253_s0 }
  0xb0   : > { %p5255_p11 = pnand %p5254_p7, %p6227_p13  ;;  %p5261_p9 = scmp.lt.u32.totalorder %s5253_s0, %s5672_s8 }
  0xb1   : > { %p5260_p8 = por %p5259_p4, %p5258_p3 }
  0xb2   : > { %p5256_p2 = pneg %p5255_p11 }
  0xb3   : > { %p5262_p10 = por %p5261_p9, %p5260_p8 }
  0xb5   : > { %p5263_p12 = pnand %p5262_p10, %p5256_p2 }
  0xb7   : > { %5266 = shalt.err (!%p5263_p12)
}
  0xb8   : > { %s5267_s19 = scalar_lea.vmem %s480_s28, 128  ;;  %s5381_s18 = smov [#allocation11]  }
  0xb9   : > { %p5268_p0 = scmp.ne.s32.totalorder %s480_s28, %s5267_s19  ;;  %s5271_s9 = sshll.u32 %s5381_s18, 4  ;;  %s5272_s9 = int_to_ptr.vmem [resolvable:$false] %s5271_s9 }
  0xba   : > { %s5273_s1 = scalar_lea.vmem %s5272_s9, 256  ;;  %p5274_p5 = scmp.lt.s32.totalorder %s480_s28, %s5272_s9 }
  0xbb   : > { %p5269_p1 = pnand %p5268_p0, %p6227_p13  ;;  %p5275_p7 = scmp.lt.s32.totalorder %s5273_s1, %s5267_s19 }
  0xbd   : > { %p5270_p6 = pneg %p5269_p1  ;;  %p5276_p11 = por %p5275_p7, %p5274_p5 }
  0xbf   : > { %p5277_p3 = pnand %p5276_p11, %p5270_p6 }
  0xc1   : > { %5280 = shalt.err (!%p5277_p3)
}
  0xc2   : > { %4762 = dma.hbm_to_vmem [thread:$0]  (%p6227_p13), %s5672_s8, 128, %s480_s28, %s466_s29  }
  0xc3 PF: > { %p6232_p2 = scmp.ne.s32.totalorder %s6222_s27, 0 }
  0xc4   : > { %s497_s21 = sand.u32 (!%p6232_p2), 1, %s5339_s10   ;;  %p6233_p4 = scmp.ne.s32.totalorder (!%p6232_p2), %s6221_s24, 0 }
  0xc5   : > { %495 = sbr.rel (%p6232_p2) target bundleno = 1267 (0x4f3), region = 52  ;;  %s4091_s26 = sshll.u32 (!%p6232_p2), %s497_s21, 10 }
  0xc6   : > { %s498_s12 = scalar_lea.sflag (!%p6232_p2), [#allocation7], %s497_s21  ;;  %s5698_s0 = scalar_lea.vmem (!%p6232_p2), [#allocation6], %s4091_s26 }
  0xcc   : > { %5314 = dma.done.wait (%p6233_p4), %s498_s12, 16384  }
  0xcd   : > { %5316 = vsyncadd (%p6233_p4), %s498_s12, 4294950912  ;;  %s6234_s22 = sadd.s32 4294967295, %s5363_s16   ;;  %s5706_s29 = scalar_lea.vmem [#allocation8], %s4091_s26 }
  0xce   : > { %s506_s8 = sand.u32 1, %s6234_s22  }
  0xcf   : > { %s507_s28 = scalar_lea.sflag [#allocation9], %s506_s8 }
  0xd0   : > { %5318 = dma.done.wait (%p6233_p4), %s507_s28, 16512  }
  0xd1   : > { %5320 = vsyncadd (%p6233_p4), %s507_s28, 4294950784  ;;  %s4093_s27 = sshll.u32 %s497_s21, 3  ;;  %s525_s17 = scalar_lea.sflag [#allocation12], %s506_s8 }
  0xd2   : > { %s5712_s25 = scalar_lea.vmem [#allocation10], %s4093_s27  ;;  %s5714_s20 = scalar_lea.vmem [#allocation11], %s4093_s27 }
  0xd3   : > { %5322 = dma.done.wait (%p6233_p4), %s525_s17, 128  }
  0xd4   : > { %5324 = vsyncadd (%p6233_p4), %s525_s17, 4294967168  ;;  %p6235_p13 = scmp.ne.s32.totalorder %s6219_s23, 0 }
  0xd6   : > { %5326 = dma.done.wait (%p6235_p13), [#allocation12], 32  }
  0xd7   : > { %5328 = vsyncadd (%p6235_p13), [#allocation12], 4294967264 }
  0xd8   : > { %5330 = dma.done.wait (%p6235_p13), [#allocation15], 48  }
  0xd9   : > { %5332 = vsyncadd (%p6235_p13), [#allocation15], 4294967248  ;;  %p603_p8 = scmp.lt.s32.totalorder %s5351_s13, 1  ;;  %s6236_s1 = sld [smem:[#allocation35_spill]] }
  0xda   : > { %s6237_s12 = sld [smem:[#allocation36_spill]]  ;;  %s6238_s8 = sld [smem:[#allocation28_spill]] }
  0xdb   : > { %s6259_s13 = smov (!%p603_p8, %s5351_s13), 1 }
  0xdc   : > { %s5730_s30 = sshll.u32 %s6259_s13, 3 }
  0xdd   : > { %s606_s19 = scalar_lea.vmem %s6198_s7, %s5730_s30 }
  0xdf   : > { %s610_s21 = scalar_lea.vmem %s6236_s1, %s5730_s30 }
  0xe0   : > { %s614_s22 = scalar_lea.vmem %s6237_s12, %s5730_s30  ;;  %p4101_p9 = scmp.ne.s32.totalorder %s6238_s8, 0 }
  0xe1   : > { %vm622_vm0 = vcmask (!%p4101_p9), 7168   ;;  %v5382_v0 = vmov (!%p4101_p9), 0.0  }
  0xe2   : > { %619 = sbr.rel (%p4101_p9) target bundleno = 233 (0xe9), region = 84  ;;  %620 = vst [vmem:[#allocation2] sm:$0xff] (!%p4101_p9), %v5382_v0  ;;  %621 = vst [vmem:[#allocation3] sm:$0xff] (!%p4101_p9), %v5382_v0 }
  0xe3   : > { %623 = vst.msk [vmem:[#allocation4] sm:$0xff] (!%p4101_p9), %vm622_vm0, %v5382_v0  ;;  %624 = vst.msk [vmem:[#allocation5] sm:$0xff] (!%p4101_p9), %vm622_vm0, %v5382_v0 }
  0xe9 PF: > { %v4873_v1 = vld [vmem:[%s5698_s0 + $0x40] sm:$0xff]   ;;  %v4877_v5 = vld [vmem:[%s5698_s0 + $0x48] sm:$0xff]   ;;  %v4881_v9 = vld [vmem:[%s5698_s0 + $0x50] sm:$0xff]   ;;  %v632_v30 = vlaneseq  ;;  %v5383_v36 = vmov 1966171168   ;;  %vm2102_vm1 = vcmask 1041409  }
  0xea   : > { %v4874_v2 = vld [vmem:[%s5698_s0 + $0xc0] sm:$0xff]   ;;  %4373 = vmatprep.subr.bf16.mxu0 %v4873_v1  ;;  %v4878_v6 = vld [vmem:[%s5698_s0 + $0xc8] sm:$0xff]   ;;  %v4882_v10 = vld [vmem:[%s5698_s0 + $0xd0] sm:$0xff]   ;;  %v630_v37 = vunpack.c.l.s4 %v5383_v36  ;;  %vm2105_vm2 = vcmask 1042434   ;;  %vm2108_vm3 = vcmask 1043459   ;;  %vm2111_vm4 = vcmask 1044484  }
  0xeb   : > { %v4875_v3 = vld [vmem:[%s5698_s0] sm:$0xff]   ;;  %4395 = vmatprep.subr.bf16.mxu1 %v4874_v2  ;;  %v4879_v7 = vld [vmem:[%s5698_s0 + $0x8] sm:$0xff]   ;;  %v4883_v11 = vld [vmem:[%s5698_s0 + $0x10] sm:$0xff]   ;;  %v633_v34 = vshrl.u32 %v632_v30, 7  ;;  %vm2114_vm5 = vcmask 1045509   ;;  %vm2117_vm6 = vcmask 1046534  }
  0xec   : > { %v4876_v4 = vld [vmem:[%s5698_s0 + $0x80] sm:$0xff]   ;;  %4374 = vmatpush3.bf16.msra.mxu0 %v4875_v3  ;;  %v4880_v8 = vld [vmem:[%s5698_s0 + $0x88] sm:$0xff]   ;;  %v4884_v12 = vld [vmem:[%s5698_s0 + $0x90] sm:$0xff]   ;;  %v631_v39 = vunpack.c.0.s8 %v630_v37  ;;  %vm2120_vm7 = vcmask 1047559   ;;  %vm3623_vm8 = vcmask 7168   ;;  %s6239_s13 = sld [smem:[#allocation28_spill]] }
  0xed   : > { %4396 = vmatpush3.bf16.msra.mxu1 %v4876_v4  ;;  %4375 = vmatprep.subr.bf16.mxu0 %v4877_v5  ;;  %v4885_v13 = vld [vmem:[%s5698_s0 + $0x58] sm:$0xff]   ;;  %v4889_v17 = vld [vmem:[%s5698_s0 + $0x60] sm:$0xff]   ;;  %v4893_v21 = vld [vmem:[%s5698_s0 + $0x68] sm:$0xff]   ;;  %v5786_v44 = vsub.s32 0, %v633_v34  ;;  %v5788_v45 = vsub.s32 1, %v633_v34 }
  0xee   : > { %4397 = vmatprep.subr.bf16.mxu1 %v4878_v6  ;;  %v4886_v14 = vld [vmem:[%s5698_s0 + $0xd8] sm:$0xff]   ;;  %v4890_v18 = vld [vmem:[%s5698_s0 + $0xe0] sm:$0xff]   ;;  %v4894_v22 = vld [vmem:[%s5698_s0 + $0xe8] sm:$0xff]   ;;  %v5781_v41 = vsub.s32 %v631_v39, %v633_v34 }
  0xef   : > { %v4887_v15 = vld [vmem:[%s5698_s0 + $0x18] sm:$0xff]   ;;  %v4891_v19 = vld [vmem:[%s5698_s0 + $0x20] sm:$0xff]   ;;  %v4895_v23 = vld [vmem:[%s5698_s0 + $0x28] sm:$0xff]  }
  0xf0   : > { %4376 = vmatpush3.bf16.msra.mxu0 %v4879_v7  ;;  %v4888_v16 = vld [vmem:[%s5698_s0 + $0x98] sm:$0xff]   ;;  %v4892_v20 = vld [vmem:[%s5698_s0 + $0xa0] sm:$0xff]   ;;  %v4896_v24 = vld [vmem:[%s5698_s0 + $0xa8] sm:$0xff]  }
  0xf1   : > { %4398 = vmatpush3.bf16.msra.mxu1 %v4880_v8  ;;  %4377 = vmatprep.subr.bf16.mxu0 %v4881_v9  ;;  %v4897_v25 = vld [vmem:[%s5698_s0 + $0x70] sm:$0xff]   ;;  %v4901_v29 = vld [vmem:[%s5698_s0 + $0x78] sm:$0xff]   ;;  %v4905_v35 = vld [vmem:[%s5698_s0 + $0x140] sm:$0xff]  }
  0xf2   : > { %4399 = vmatprep.subr.bf16.mxu1 %v4882_v10  ;;  %v4898_v26 = vld [vmem:[%s5698_s0 + $0xf0] sm:$0xff]   ;;  %v4902_v31 = vld [vmem:[%s5698_s0 + $0xf8] sm:$0xff]   ;;  %v4906_v38 = vld [vmem:[%s5698_s0 + $0x1c0] sm:$0xff]   ;;  %p4366_p10 = scmp.ne.s32.totalorder %s6239_s13, 1 }
  0xf3   : > { %v4899_v27 = vld [vmem:[%s5698_s0 + $0x30] sm:$0xff]   ;;  %v4903_v32 = vld [vmem:[%s5698_s0 + $0x38] sm:$0xff]   ;;  %v5140_v40 = vld.sshfl [vmem:[%s5712_s25] sm:$0xff pattern:$0x75316420]  ;;  %vm5386_vm9 = vmmov (!%p4366_p10), 0  }
  0xf4   : > { %4378 = vmatpush3.bf16.msra.mxu0 %v4883_v11  ;;  %v4900_v28 = vld [vmem:[%s5698_s0 + $0xb0] sm:$0xff]   ;;  %v4904_v33 = vld [vmem:[%s5698_s0 + $0xb8] sm:$0xff]   ;;  %v636_v42 = vcombine.high %v5140_v40, %v5140_v40  ;;  %v5784_v43 = vrot.slane %v5140_v40, %v5781_v41  ;;  %v4907_v52 = vld [vmem:[%s5698_s0 + $0x100] sm:$0xff]   ;;  %vm3807_vm10 = vcmask (!%p4366_p10), 15360  }
  0xf5   : > { %4400 = vmatpush3.bf16.msra.mxu1 %v4884_v12  ;;  %4379 = vmatprep.subr.bf16.mxu0 %v4885_v13  ;;  %v4909_v54 = vld [vmem:[%s5698_s0 + $0x148] sm:$0xff]   ;;  %v4908_v58 = vld [vmem:[%s5698_s0 + $0x180] sm:$0xff]   ;;  %v4913_v63 = vld [vmem:[%s5698_s0 + $0x150] sm:$0xff]  }
  0xf6   : > { %4401 = vmatprep.subr.bf16.mxu1 %v4886_v14  ;;  %v4102_v46 = vpack.i.b16 %v5784_v43, %v5784_v43  ;;  %v654_v47 = vunpack.i.h.s16 %v5784_v43  ;;  %v5794_v48 = vrot.slane %v636_v42, %v5781_v41  ;;  %v4910_v60 = vld [vmem:[%s5698_s0 + $0x1c8] sm:$0xff]   ;;  %v4914_v2 = vld [vmem:[%s5698_s0 + $0x1d0] sm:$0xff]   ;;  %v4917_v4 = vld [vmem:[%s5698_s0 + $0x158] sm:$0xff]  }
  0xf7   : > { %v4911_v62 = vld [vmem:[%s5698_s0 + $0x108] sm:$0xff]   ;;  %v4915_v3 = vld [vmem:[%s5698_s0 + $0x110] sm:$0xff]   ;;  %v4918_v6 = vld [vmem:[%s5698_s0 + $0x1d8] sm:$0xff]  }
  0xf8   : > { %4380 = vmatpush3.bf16.msra.mxu0 %v4887_v15  ;;  %v925_v49 = vrot.slane %v4102_v46, %v5788_v45  ;;  %v1064_v50 = vpack.i.b16 %v654_v47, %v654_v47  ;;  %v921_v51 = vrot.slane %v4102_v46, %v5786_v44  ;;  %v5801_v53 = vpack.i.b16 %v5794_v48, %v5794_v48  ;;  %v4912_v1 = vld [vmem:[%s5698_s0 + $0x188] sm:$0xff]   ;;  %v4916_v5 = vld [vmem:[%s5698_s0 + $0x190] sm:$0xff]   ;;  %v4919_v7 = vld [vmem:[%s5698_s0 + $0x118] sm:$0xff]  }
  0xf9   : > { %4402 = vmatpush3.bf16.msra.mxu1 %v4888_v16  ;;  %4381 = vmatprep.subr.bf16.mxu0 %v4889_v17  ;;  %v656_v55 = vunpack.i.h.s16 %v5794_v48  ;;  %v4921_v8 = vld [vmem:[%s5698_s0 + $0x160] sm:$0xff]   ;;  %v4920_v9 = vld [vmem:[%s5698_s0 + $0x198] sm:$0xff]   ;;  %v4925_v12 = vld [vmem:[%s5698_s0 + $0x168] sm:$0xff]  }
  0xfa   : > { %4403 = vmatprep.subr.bf16.mxu1 %v4890_v18  ;;  %1056 = vmatprep.mubr.bf16.mxu0 %v925_v49  ;;  %v1072_v56 = vrot.slane %v1064_v50, %v5788_v45  ;;  %v1068_v57 = vrot.slane %v1064_v50, %v5786_v44  ;;  %v1219_v59 = vrot.slane %v5801_v53, %v5788_v45  ;;  %v4922_v10 = vld [vmem:[%s5698_s0 + $0x1e0] sm:$0xff]   ;;  %v4926_v14 = vld [vmem:[%s5698_s0 + $0x1e8] sm:$0xff]   ;;  %v4929_v16 = vld [vmem:[%s5698_s0 + $0x170] sm:$0xff]  }
  0xfb   : > { %v5811_v61 = vpack.i.b16 %v656_v55, %v656_v55  ;;  %v4923_v11 = vld [vmem:[%s5698_s0 + $0x120] sm:$0xff]   ;;  %v4927_v15 = vld [vmem:[%s5698_s0 + $0x128] sm:$0xff]   ;;  %v651_v18 = vcombine.high %v5784_v43, %v5784_v43  ;;  %v4945_v42 = vld [vmem:[%s5698_s0 + $0x250] sm:$0xff]  }
  0xfc   : > { %4382 = vmatpush3.bf16.msra.mxu0 %v4891_v19  ;;  %1203 = vmatprep.mubr.bf16.mxu1 %v1072_v56  ;;  %v4924_v13 = vld [vmem:[%s5698_s0 + $0x1a0] sm:$0xff]   ;;  %v4928_v17 = vld [vmem:[%s5698_s0 + $0x1a8] sm:$0xff]   ;;  %v4930_v19 = vld [vmem:[%s5698_s0 + $0x1f0] sm:$0xff]  }
  0xfd   : > { %4404 = vmatpush3.bf16.msra.mxu1 %v4892_v20  ;;  %4383 = vmatprep.subr.bf16.mxu0 %v4893_v21  ;;  %v1366_v0 = vrot.slane %v5811_v61, %v5788_v45  ;;  %v4931_v20 = vld [vmem:[%s5698_s0 + $0x130] sm:$0xff]   ;;  %v4933_v21 = vld [vmem:[%s5698_s0 + $0x178] sm:$0xff]   ;;  %v4941_v36 = vld [vmem:[%s5698_s0 + $0x248] sm:$0xff]  }
  0xfe   : > { %4405 = vmatprep.subr.bf16.mxu1 %v4894_v22  ;;  %v4932_v22 = vld [vmem:[%s5698_s0 + $0x1b0] sm:$0xff]   ;;  %v4940_v37 = vld [vmem:[%s5698_s0 + $0x280] sm:$0xff]   ;;  %v4942_v39 = vld [vmem:[%s5698_s0 + $0x2c8] sm:$0xff]  }
  0xff   : > { %v4943_v40 = vld [vmem:[%s5698_s0 + $0x208] sm:$0xff]   ;;  %v4946_v46 = vld [vmem:[%s5698_s0 + $0x2d0] sm:$0xff]   ;;  %v4949_v49 = vld [vmem:[%s5698_s0 + $0x258] sm:$0xff]  }
 0x100   : > { %4384 = vmatpush3.bf16.msra.mxu0 %v4895_v23  ;;  %v658_v23 = vunpack.i.h.s16 %v651_v18  ;;  %v4944_v43 = vld [vmem:[%s5698_s0 + $0x288] sm:$0xff]   ;;  %v4947_v47 = vld [vmem:[%s5698_s0 + $0x210] sm:$0xff]   ;;  %v4954_v55 = vld [vmem:[%s5698_s0 + $0x2e0] sm:$0xff]  }
 0x101   : > { %4406 = vmatpush3.bf16.msra.mxu1 %v4896_v24  ;;  %4385 = vmatprep.subr.bf16.mxu0 %v4897_v25  ;;  %v4934_v24 = vld [vmem:[%s5698_s0 + $0x1f8] sm:$0xff]   ;;  %v4948_v50 = vld [vmem:[%s5698_s0 + $0x290] sm:$0xff]   ;;  %v4955_v56 = vld [vmem:[%s5698_s0 + $0x220] sm:$0xff]  }
 0x102   : > { %4407 = vmatprep.subr.bf16.mxu1 %v4898_v26  ;;  %v4935_v25 = vld [vmem:[%s5698_s0 + $0x138] sm:$0xff]   ;;  %v5842_v26 = vpack.i.b16 %v651_v18, %v651_v18  ;;  %v4974_v18 = vld [vmem:[%s5698_s0 + $0x3c8] sm:$0xff]  }
 0x104   : > { %4386 = vmatpush3.bf16.msra.mxu0 %v4899_v27  ;;  %v4937_v27 = vld [vmem:[%s5698_s0 + $0x240] sm:$0xff]   ;;  %v1513_v34 = vrot.slane %v5842_v26, %v5788_v45 }
 0x105   : > { %4408 = vmatpush3.bf16.msra.mxu1 %v4900_v28  ;;  %4387 = vmatprep.subr.bf16.mxu0 %v4901_v29  ;;  %v4936_v28 = vld [vmem:[%s5698_s0 + $0x1b8] sm:$0xff]   ;;  %v5846_v29 = vpack.i.b16 %v658_v23, %v658_v23  ;;  %v4979_v23 = vld [vmem:[%s5698_s0 + $0x310] sm:$0xff]  }
 0x106   : > { %4409 = vmatprep.subr.bf16.mxu1 %v4902_v31  ;;  %v1215_v31 = vrot.slane %v5801_v53, %v5786_v44  ;;  %v4953_v53 = vld [vmem:[%s5698_s0 + $0x260] sm:$0xff]  }
 0x108   : > { %4388 = vmatpush3.bf16.msra.mxu0 %v4903_v32  ;;  %v4938_v32 = vld [vmem:[%s5698_s0 + $0x2c0] sm:$0xff]  }
 0x109   : > { %4410 = vmatpush3.bf16.msra.mxu1 %v4904_v33  ;;  %4417 = vmatprep.subr.bf16.mxu0 %v4905_v35  ;;  %v4939_v33 = vld [vmem:[%s5698_s0 + $0x200] sm:$0xff]   ;;  %v1362_v35 = vrot.slane %v5811_v61, %v5786_v44  ;;  %v4961_v61 = vld [vmem:[%s5698_s0 + $0x270] sm:$0xff]  }
 0x10a   : > { %4439 = vmatprep.subr.bf16.mxu1 %v4906_v38  ;;  %v1660_v38 = vrot.slane %v5846_v29, %v5788_v45 }
 0x10b   : > { %1057 = vmatmul.mubr.bf16.vlgmr.msra.gmra.mrb[0].mxu0 %v921_v51  ;;  %v4950_v51 = vld [vmem:[%s5698_s0 + $0x2d8] sm:$0xff]  }
 0x10c   : > { %4418 = vmatpush3.bf16.msra.mxu0 %v4907_v52  ;;  %1204 = vmatmul.mubr.bf16.vlgmr.msra.gmra.mrb[0].mxu1 %v1068_v57  ;;  %v4951_v52 = vld [vmem:[%s5698_s0 + $0x218] sm:$0xff]   ;;  %v4957_v57 = vld [vmem:[%s5698_s0 + $0x268] sm:$0xff]  }
 0x10d   : > { %4419 = vmatprep.subr.bf16.mxu0 %v4909_v54  ;;  %4440 = vmatpush3.bf16.msra.mxu1 %v4908_v58  ;;  %v4952_v54 = vld [vmem:[%s5698_s0 + $0x298] sm:$0xff]   ;;  %v4956_v58 = vld [vmem:[%s5698_s0 + $0x2a0] sm:$0xff]  }
 0x10e   : > { %1350 = vmatprep.mubr.bf16.mxu0 %v1219_v59  ;;  %4441 = vmatprep.subr.bf16.mxu1 %v4910_v60  ;;  %v4958_v59 = vld [vmem:[%s5698_s0 + $0x2e8] sm:$0xff]  }
 0x10f   : > { %1497 = vmatprep.mubr.bf16.mxu1 %v1366_v0  ;;  %v4959_v60 = vld [vmem:[%s5698_s0 + $0x228] sm:$0xff]   ;;  %v4962_v0 = vld [vmem:[%s5698_s0 + $0x2f0] sm:$0xff]  }
 0x110   : > { %4420 = vmatpush3.bf16.msra.mxu0 %v4911_v62  ;;  %v4960_v62 = vld [vmem:[%s5698_s0 + $0x2a8] sm:$0xff]  }
 0x111   : > { %4421 = vmatprep.subr.bf16.mxu0 %v4913_v63  ;;  %4442 = vmatpush3.bf16.msra.mxu1 %v4912_v1  ;;  %v652_v63 = vcombine.high %v5794_v48, %v5794_v48  ;;  %v4963_v1 = vld [vmem:[%s5698_s0 + $0x230] sm:$0xff]   ;;  %v4969_v48 = vld [vmem:[%s5698_s0 + $0x340] sm:$0xff]  }
 0x112   : > { %4443 = vmatprep.subr.bf16.mxu1 %v4914_v2  ;;  %v4965_v2 = vld [vmem:[%s5698_s0 + $0x278] sm:$0xff]  }
 0x114   : > { %4422 = vmatpush3.bf16.msra.mxu0 %v4915_v3  ;;  %v4964_v3 = vld [vmem:[%s5698_s0 + $0x2b0] sm:$0xff]  }
 0x115   : > { %4423 = vmatprep.subr.bf16.mxu0 %v4917_v4  ;;  %4444 = vmatpush3.bf16.msra.mxu1 %v4916_v5  ;;  %v660_v4 = vunpack.i.h.s16 %v652_v63  ;;  %v4966_v5 = vld [vmem:[%s5698_s0 + $0x2f8] sm:$0xff]  }
 0x116   : > { %4445 = vmatprep.subr.bf16.mxu1 %v4918_v6  ;;  %v4967_v6 = vld [vmem:[%s5698_s0 + $0x238] sm:$0xff]  }
 0x118   : > { %4424 = vmatpush3.bf16.msra.mxu0 %v4919_v7  ;;  %v5888_v7 = vpack.i.b16 %v652_v63, %v652_v63  ;;  %v5013_v63 = vld [vmem:[%s5706_s29 + $0x58] sm:$0xff]  }
 0x119   : > { %4425 = vmatprep.subr.bf16.mxu0 %v4921_v8  ;;  %4446 = vmatpush3.bf16.msra.mxu1 %v4920_v9  ;;  %v4968_v8 = vld [vmem:[%s5698_s0 + $0x2b8] sm:$0xff]   ;;  %v5892_v9 = vpack.i.b16 %v660_v4, %v660_v4 }
 0x11a   : > { %4447 = vmatprep.subr.bf16.mxu1 %v4922_v10  ;;  %v1509_v10 = vrot.slane %v5842_v26, %v5786_v44  ;;  %v4982_v26 = vld [vmem:[%s5698_s0 + $0x3d8] sm:$0xff]  }
 0x11b   : > { %v5016_v4 = vld [vmem:[%s5706_s29 + $0x98] sm:$0xff]  }
 0x11c   : > { %4426 = vmatpush3.bf16.msra.mxu0 %v4923_v11  ;;  %v4970_v11 = vld [vmem:[%s5698_s0 + $0x3c0] sm:$0xff]  }
 0x11d   : > { %4427 = vmatprep.subr.bf16.mxu0 %v4925_v12  ;;  %4448 = vmatpush3.bf16.msra.mxu1 %v4924_v13  ;;  %v4971_v12 = vld [vmem:[%s5698_s0 + $0x300] sm:$0xff]   ;;  %v1807_v13 = vrot.slane %v5888_v7, %v5788_v45 }
 0x11e   : > { %4449 = vmatprep.subr.bf16.mxu1 %v4926_v14  ;;  %v1656_v14 = vrot.slane %v5846_v29, %v5786_v44  ;;  %v4984_v29 = vld [vmem:[%s5698_s0 + $0x398] sm:$0xff]  }
 0x120   : > { %4428 = vmatpush3.bf16.msra.mxu0 %v4927_v15  ;;  %v4973_v15 = vld [vmem:[%s5698_s0 + $0x348] sm:$0xff]  }
 0x121   : > { %4429 = vmatprep.subr.bf16.mxu0 %v4929_v16  ;;  %4450 = vmatpush3.bf16.msra.mxu1 %v4928_v17  ;;  %v4972_v16 = vld [vmem:[%s5698_s0 + $0x380] sm:$0xff]   ;;  %v1954_v17 = vrot.slane %v5892_v9, %v5788_v45 }
 0x122   : > { %4451 = vmatprep.subr.bf16.mxu1 %v4930_v19  ;;  %v4975_v19 = vld [vmem:[%s5698_s0 + $0x308] sm:$0xff]  }
 0x124   : > { %4430 = vmatpush3.bf16.msra.mxu0 %v4931_v20  ;;  %v4977_v20 = vld [vmem:[%s5698_s0 + $0x350] sm:$0xff]  }
 0x125   : > { %4431 = vmatprep.subr.bf16.mxu0 %v4933_v21  ;;  %4452 = vmatpush3.bf16.msra.mxu1 %v4932_v22  ;;  %v4976_v21 = vld [vmem:[%s5698_s0 + $0x388] sm:$0xff]   ;;  %v4978_v22 = vld [vmem:[%s5698_s0 + $0x3d0] sm:$0xff]  }
 0x126   : > { %4453 = vmatprep.subr.bf16.mxu1 %v4934_v24  ;;  %v4981_v24 = vld [vmem:[%s5698_s0 + $0x358] sm:$0xff]  }
 0x128   : > { %4432 = vmatpush3.bf16.msra.mxu0 %v4935_v25  ;;  %v4980_v25 = vld [vmem:[%s5698_s0 + $0x390] sm:$0xff]  }
 0x129   : > { %4461 = vmatprep.subr.bf16.mxu0 %v4937_v27  ;;  %4454 = vmatpush3.bf16.msra.mxu1 %v4936_v28  ;;  %v4983_v27 = vld [vmem:[%s5698_s0 + $0x318] sm:$0xff]   ;;  %v4985_v28 = vld [vmem:[%s5698_s0 + $0x360] sm:$0xff]  }
 0x12a   : > { %4483 = vmatprep.subr.bf16.mxu1 %v4938_v32  ;;  %v4987_v32 = vld [vmem:[%s5698_s0 + $0x320] sm:$0xff]  }
 0x12b   : > { %1351 = vmatmul.mubr.bf16.vlgmr.msra.gmra.mrb[4].mxu0 %v1215_v31  ;;  %v4986_v31 = vld [vmem:[%s5698_s0 + $0x3e0] sm:$0xff]  }
 0x12c   : > { %4462 = vmatpush3.bf16.msra.mxu0 %v4939_v33  ;;  %1644 = vmatprep.mubr.bf16.mxu0 %v1513_v34  ;;  %v4989_v33 = vld [vmem:[%s5698_s0 + $0x368] sm:$0xff]   ;;  %v4988_v34 = vld [vmem:[%s5698_s0 + $0x3a0] sm:$0xff]  }
 0x12d   : > { %1498 = vmatmul.mubr.bf16.vlgmr.msra.gmra.mrb[4].mxu1 %v1362_v35  ;;  %4463 = vmatprep.subr.bf16.mxu0 %v4941_v36  ;;  %v4990_v35 = vld [vmem:[%s5698_s0 + $0x3e8] sm:$0xff]  }
 0x12e   : > { %4484 = vmatpush3.bf16.msra.mxu1 %v4940_v37  ;;  %1791 = vmatprep.mubr.bf16.mxu1 %v1660_v38  ;;  %v4991_v36 = vld [vmem:[%s5698_s0 + $0x328] sm:$0xff]   ;;  %v4993_v37 = vld [vmem:[%s5698_s0 + $0x370] sm:$0xff]  }
 0x12f   : > { %4485 = vmatprep.subr.bf16.mxu1 %v4942_v39  ;;  %v4992_v38 = vld [vmem:[%s5698_s0 + $0x3a8] sm:$0xff]   ;;  %v4994_v39 = vld [vmem:[%s5698_s0 + $0x3f0] sm:$0xff]  }
 0x130   : > { %4464 = vmatpush3.bf16.msra.mxu0 %v4943_v40  ;;  %v4995_v40 = vld [vmem:[%s5698_s0 + $0x330] sm:$0xff]  }
 0x131   : > { %4465 = vmatprep.subr.bf16.mxu0 %v4945_v42  ;;  %v4997_v42 = vld [vmem:[%s5698_s0 + $0x378] sm:$0xff]  }
 0x132   : > { %4486 = vmatpush3.bf16.msra.mxu1 %v4944_v43  ;;  %v4996_v43 = vld [vmem:[%s5698_s0 + $0x3b0] sm:$0xff]  }
 0x133   : > { %4487 = vmatprep.subr.bf16.mxu1 %v4946_v46  ;;  %v4998_v46 = vld [vmem:[%s5698_s0 + $0x3f8] sm:$0xff]  }
 0x134   : > { %4466 = vmatpush3.bf16.msra.mxu0 %v4947_v47  ;;  %v4999_v47 = vld [vmem:[%s5698_s0 + $0x338] sm:$0xff]  }
 0x135   : > { %4467 = vmatprep.subr.bf16.mxu0 %v4949_v49  ;;  %v5001_v49 = vld [vmem:[%s5706_s29 + $0x40] sm:$0xff]  }
 0x136   : > { %4488 = vmatpush3.bf16.msra.mxu1 %v4948_v50  ;;  %v5000_v50 = vld [vmem:[%s5698_s0 + $0x3b8] sm:$0xff]  }
 0x137   : > { %4489 = vmatprep.subr.bf16.mxu1 %v4950_v51  ;;  %v1803_v51 = vrot.slane %v5888_v7, %v5786_v44  ;;  %v5021_v7 = vld [vmem:[%s5706_s29 + $0x68] sm:$0xff]  }
 0x138   : > { %4468 = vmatpush3.bf16.msra.mxu0 %v4951_v52  ;;  %v5002_v52 = vld [vmem:[%s5706_s29 + $0xc0] sm:$0xff]  }
 0x139   : > { %4469 = vmatprep.subr.bf16.mxu0 %v4953_v53  ;;  %v5003_v53 = vld [vmem:[%s5706_s29] sm:$0xff]  }
 0x13a   : > { %4490 = vmatpush3.bf16.msra.mxu1 %v4952_v54  ;;  %v1950_v54 = vrot.slane %v5892_v9, %v5786_v44  ;;  %v5960_v9 = vld [vmem:[%s5714_s20] sm:$0xff] }
 0x13b   : > { %4491 = vmatprep.subr.bf16.mxu1 %v4954_v55  ;;  %v5005_v55 = vld [vmem:[%s5706_s29 + $0x48] sm:$0xff]  }
 0x13c   : > { %4470 = vmatpush3.bf16.msra.mxu0 %v4955_v56  ;;  %v5004_v56 = vld [vmem:[%s5706_s29 + $0x80] sm:$0xff]  }
 0x13d   : > { %4471 = vmatprep.subr.bf16.mxu0 %v4957_v57  ;;  %v5006_v57 = vld [vmem:[%s5706_s29 + $0xc8] sm:$0xff]  }
 0x13e   : > { %4492 = vmatpush3.bf16.msra.mxu1 %v4956_v58  ;;  %v5007_v58 = vld [vmem:[%s5706_s29 + $0x8] sm:$0xff]  }
 0x13f   : > { %4493 = vmatprep.subr.bf16.mxu1 %v4958_v59  ;;  %v5009_v59 = vld [vmem:[%s5706_s29 + $0x50] sm:$0xff]  }
 0x140   : > { %4472 = vmatpush3.bf16.msra.mxu0 %v4959_v60  ;;  %v5008_v60 = vld [vmem:[%s5706_s29 + $0x88] sm:$0xff]  }
 0x141   : > { %4473 = vmatprep.subr.bf16.mxu0 %v4961_v61  ;;  %v5010_v61 = vld [vmem:[%s5706_s29 + $0xd0] sm:$0xff]  }
 0x142   : > { %4494 = vmatpush3.bf16.msra.mxu1 %v4960_v62  ;;  %v5011_v62 = vld [vmem:[%s5706_s29 + $0x10] sm:$0xff]  }
 0x143   : > { %4495 = vmatprep.subr.bf16.mxu1 %v4962_v0  ;;  %v5012_v0 = vld [vmem:[%s5706_s29 + $0x90] sm:$0xff]  }
 0x144   : > { %4474 = vmatpush3.bf16.msra.mxu0 %v4963_v1  ;;  %v5014_v1 = vld [vmem:[%s5706_s29 + $0xd8] sm:$0xff]  }
 0x145   : > { %4475 = vmatprep.subr.bf16.mxu0 %v4965_v2  ;;  %v5015_v2 = vld [vmem:[%s5706_s29 + $0x18] sm:$0xff]  }
 0x146   : > { %4496 = vmatpush3.bf16.msra.mxu1 %v4964_v3  ;;  %v5017_v3 = vld [vmem:[%s5706_s29 + $0x60] sm:$0xff]  }
 0x147   : > { %4497 = vmatprep.subr.bf16.mxu1 %v4966_v5  ;;  %v5018_v5 = vld [vmem:[%s5706_s29 + $0xe0] sm:$0xff]  }
 0x148   : > { %4476 = vmatpush3.bf16.msra.mxu0 %v4967_v6  ;;  %v5019_v6 = vld [vmem:[%s5706_s29 + $0x20] sm:$0xff]  }
 0x149   : > { %4505 = vmatprep.subr.bf16.mxu0 %v4969_v48  ;;  %v5020_v48 = vld [vmem:[%s5706_s29 + $0xa0] sm:$0xff]  }
 0x14a   : > { %4498 = vmatpush3.bf16.msra.mxu1 %v4968_v8  ;;  %v5022_v8 = vld [vmem:[%s5706_s29 + $0xe8] sm:$0xff]  }
 0x14b   : > { %1645 = vmatmul.mubr.bf16.vlgmr.msra.gmra.mrb[8].mxu0 %v1509_v10  ;;  %4527 = vmatprep.subr.bf16.mxu1 %v4970_v11  ;;  %v5023_v10 = vld [vmem:[%s5706_s29 + $0x28] sm:$0xff]   ;;  %v2133_v11 = vrot.slane %v5960_v9, %v5781_v41 }
 0x14c   : > { %4506 = vmatpush3.bf16.msra.mxu0 %v4971_v12  ;;  %1938 = vmatprep.mubr.bf16.mxu0 %v1807_v13  ;;  %v5025_v12 = vld [vmem:[%s5706_s29 + $0x70] sm:$0xff]   ;;  %v5024_v13 = vld [vmem:[%s5706_s29 + $0xa8] sm:$0xff]  }
 0x14d   : > { %1792 = vmatmul.mubr.bf16.vlgmr.msra.gmra.mrb[8].mxu1 %v1656_v14  ;;  %4507 = vmatprep.subr.bf16.mxu0 %v4973_v15  ;;  %v5968_v14 = vrot.slane %v2133_v11, %v5781_v41  ;;  %v2134_v15 = vcombine.high %v2133_v11, %v2133_v11  ;;  %v5064_v11 = vld [vmem:[%s5706_s29 + $0x1b8] sm:$0xff]  }
 0x14e   : > { %4528 = vmatpush3.bf16.msra.mxu1 %v4972_v16  ;;  %2085 = vmatprep.mubr.bf16.mxu1 %v1954_v17  ;;  %v5026_v16 = vld [vmem:[%s5706_s29 + $0xf0] sm:$0xff]  }
 0x14f   : > { %4529 = vmatprep.subr.bf16.mxu1 %v4974_v18  ;;  %v5027_v17 = vld [vmem:[%s5706_s29 + $0x30] sm:$0xff]   ;;  %v4234_v18 = vpack.i.b16 %v5968_v14, %v5968_v14 }
 0x150   : > { %4508 = vmatpush3.bf16.msra.mxu0 %v4975_v19  ;;  %v2152_v19 = vunpack.i.h.s16 %v5968_v14 }
 0x151   : > { %4509 = vmatprep.subr.bf16.mxu0 %v4977_v20  ;;  %v5976_v20 = vrot.slane %v2134_v15, %v5781_v41 }
 0x152   : > { %4530 = vmatpush3.bf16.msra.mxu1 %v4976_v21  ;;  %v5029_v21 = vld [vmem:[%s5706_s29 + $0x78] sm:$0xff]  }
 0x153   : > { %4531 = vmatprep.subr.bf16.mxu1 %v4978_v22  ;;  %v5028_v22 = vld [vmem:[%s5706_s29 + $0xb0] sm:$0xff]  }
 0x154   : > { %4510 = vmatpush3.bf16.msra.mxu0 %v4979_v23  ;;  %v2423_v23 = vrot.slane %v4234_v18, %v5788_v45 }
 0x155   : > { %4511 = vmatprep.subr.bf16.mxu0 %v4981_v24  ;;  %v2562_v24 = vpack.i.b16 %v2152_v19, %v2152_v19  ;;  %v3627_v19 = vunpack.c.h.bf16 %v5960_v9 }
 0x156   : > { %4532 = vmatpush3.bf16.msra.mxu1 %v4980_v25  ;;  %v5030_v25 = vld [vmem:[%s5706_s29 + $0xf8] sm:$0xff]  }
 0x157   : > { %4533 = vmatprep.subr.bf16.mxu1 %v4982_v26  ;;  %v2154_v26 = vunpack.i.h.s16 %v5976_v20  ;;  %v2570_v41 = vrot.slane %v2562_v24, %v5788_v45 }
 0x158   : > { %4512 = vmatpush3.bf16.msra.mxu0 %v4983_v27  ;;  %v5031_v27 = vld [vmem:[%s5706_s29 + $0x38] sm:$0xff]  }
 0x159   : > { %4513 = vmatprep.subr.bf16.mxu0 %v4985_v28  ;;  %v5987_v28 = vpack.i.b16 %v5976_v20, %v5976_v20 }
 0x15a   : > { %4534 = vmatpush3.bf16.msra.mxu1 %v4984_v29  ;;  %v5033_v29 = vld [vmem:[%s5706_s29 + $0x140] sm:$0xff]  }
 0x15b   : > { %4535 = vmatprep.subr.bf16.mxu1 %v4986_v31  ;;  %v5032_v31 = vld [vmem:[%s5706_s29 + $0xb8] sm:$0xff]  }
 0x15c   : > { %4514 = vmatpush3.bf16.msra.mxu0 %v4987_v32  ;;  %v5991_v32 = vpack.i.b16 %v2154_v26, %v2154_v26  ;;  %v5068_v26 = vld [vmem:[%s5706_s29 + $0x280] sm:$0xff]  }
 0x15d   : > { %4515 = vmatprep.subr.bf16.mxu0 %v4989_v33  ;;  %v2419_v33 = vrot.slane %v4234_v18, %v5786_v44  ;;  %v3626_v18 = vunpack.c.l.bf16 %v5960_v9  ;;  %v5070_v9 = vld [vmem:[%s5706_s29 + $0x2c8] sm:$0xff]  }
 0x15e   : > { %4536 = vmatpush3.bf16.msra.mxu1 %v4988_v34  ;;  %v5034_v34 = vld [vmem:[%s5706_s29 + $0x1c0] sm:$0xff]  }
 0x15f   : > { %4537 = vmatprep.subr.bf16.mxu1 %v4990_v35  ;;  %v5035_v35 = vld [vmem:[%s5706_s29 + $0x100] sm:$0xff]  }
 0x160   : > { %4516 = vmatpush3.bf16.msra.mxu0 %v4991_v36  ;;  %v2717_v36 = vrot.slane %v5987_v28, %v5788_v45 }
 0x161   : > { %4517 = vmatprep.subr.bf16.mxu0 %v4993_v37  ;;  %v2566_v37 = vrot.slane %v2562_v24, %v5786_v44  ;;  %v2860_v24 = vrot.slane %v5991_v32, %v5786_v44 }
 0x162   : > { %4538 = vmatpush3.bf16.msra.mxu1 %v4992_v38  ;;  %v5037_v38 = vld [vmem:[%s5706_s29 + $0x148] sm:$0xff]  }
 0x163   : > { %4539 = vmatprep.subr.bf16.mxu1 %v4994_v39  ;;  %v5036_v39 = vld [vmem:[%s5706_s29 + $0x180] sm:$0xff]  }
 0x164   : > { %4518 = vmatpush3.bf16.msra.mxu0 %v4995_v40  ;;  %v2864_v40 = vrot.slane %v5991_v32, %v5788_v45  ;;  %v5074_v32 = vld [vmem:[%s5706_s29 + $0x2d0] sm:$0xff]  }
 0x165   : > { %4519 = vmatprep.subr.bf16.mxu0 %v4997_v42  ;;  %v5038_v42 = vld [vmem:[%s5706_s29 + $0x1c8] sm:$0xff]  }
 0x166   : > { %4540 = vmatpush3.bf16.msra.mxu1 %v4996_v43  ;;  %v5039_v43 = vld [vmem:[%s5706_s29 + $0x108] sm:$0xff]  }
 0x167   : > { %4541 = vmatprep.subr.bf16.mxu1 %v4998_v46  ;;  %v5041_v46 = vld [vmem:[%s5706_s29 + $0x150] sm:$0xff]  }
 0x168   : > { %4520 = vmatpush3.bf16.msra.mxu0 %v4999_v47  ;;  %v5040_v47 = vld [vmem:[%s5706_s29 + $0x188] sm:$0xff]  }
 0x169   : > { %4549 = vmatprep.subr.bf16.mxu0 %v5001_v49  ;;  %v5042_v49 = vld [vmem:[%s5706_s29 + $0x1d0] sm:$0xff]  }
 0x16a   : > { %4542 = vmatpush3.bf16.msra.mxu1 %v5000_v50  ;;  %v5043_v50 = vld [vmem:[%s5706_s29 + $0x110] sm:$0xff]  }
 0x16b   : > { %1939 = vmatmul.mubr.bf16.vlgmr.msra.gmra.mrb[12].mxu0 %v1803_v51  ;;  %4571 = vmatprep.subr.bf16.mxu1 %v5002_v52  ;;  %v5045_v51 = vld [vmem:[%s5706_s29 + $0x158] sm:$0xff]   ;;  %v5044_v52 = vld [vmem:[%s5706_s29 + $0x190] sm:$0xff]  }
 0x16c   : > { %4550 = vmatpush3.bf16.msra.mxu0 %v5003_v53  ;;  %2554 = vmatprep.mubr.bf16.mxu0 %v2423_v23  ;;  %v5046_v53 = vld [vmem:[%s5706_s29 + $0x1d8] sm:$0xff]  }
 0x16d   : > { %2086 = vmatmul.mubr.bf16.vlgmr.msra.gmra.mrb[12].mxu1 %v1950_v54  ;;  %4551 = vmatprep.subr.bf16.mxu0 %v5005_v55  ;;  %v5047_v54 = vld [vmem:[%s5706_s29 + $0x118] sm:$0xff]   ;;  %v5049_v55 = vld [vmem:[%s5706_s29 + $0x160] sm:$0xff]  }
 0x16e   : > { %4572 = vmatpush3.bf16.msra.mxu1 %v5004_v56  ;;  %2701 = vmatprep.mubr.bf16.mxu1 %v2570_v41  ;;  %v5048_v56 = vld [vmem:[%s5706_s29 + $0x198] sm:$0xff]   ;;  %v3628_v41 = vadd.f32 %v3627_v19, %v3626_v18  ;;  %v5114_v18 = vld [vmem:[%s5706_s29 + $0x3e0] sm:$0xff]  }
 0x16f   : > { %4573 = vmatprep.subr.bf16.mxu1 %v5006_v57  ;;  %v5050_v57 = vld [vmem:[%s5706_s29 + $0x1e0] sm:$0xff]  }
 0x170   : > { %4552 = vmatpush3.bf16.msra.mxu0 %v5007_v58  ;;  %v5051_v58 = vld [vmem:[%s5706_s29 + $0x120] sm:$0xff]  }
 0x171   : > { %4553 = vmatprep.subr.bf16.mxu0 %v5009_v59  ;;  %v5053_v59 = vld [vmem:[%s5706_s29 + $0x168] sm:$0xff]   ;;  %v5115_v19 = vld [vmem:[%s5706_s29 + $0x320] sm:$0xff]  }
 0x172   : > { %4574 = vmatpush3.bf16.msra.mxu1 %v5008_v60  ;;  %v5052_v60 = vld [vmem:[%s5706_s29 + $0x1a0] sm:$0xff]  }
 0x173   : > { %4575 = vmatprep.subr.bf16.mxu1 %v5010_v61  ;;  %v5054_v61 = vld [vmem:[%s5706_s29 + $0x1e8] sm:$0xff]  }
 0x174   : > { %4554 = vmatpush3.bf16.msra.mxu0 %v5011_v62  ;;  %v5055_v62 = vld [vmem:[%s5706_s29 + $0x128] sm:$0xff]  }
 0x175   : > { %4555 = vmatprep.subr.bf16.mxu0 %v5013_v63  ;;  %v5057_v63 = vld [vmem:[%s5706_s29 + $0x170] sm:$0xff]  }
 0x176   : > { %4576 = vmatpush3.bf16.msra.mxu1 %v5012_v0  ;;  %v5056_v0 = vld [vmem:[%s5706_s29 + $0x1a8] sm:$0xff]  }
 0x177   : > { %4577 = vmatprep.subr.bf16.mxu1 %v5014_v1  ;;  %v2149_v1 = vcombine.high %v5968_v14, %v5968_v14 }
 0x178   : > { %4556 = vmatpush3.bf16.msra.mxu0 %v5015_v2  ;;  %v5058_v2 = vld [vmem:[%s5706_s29 + $0x1f0] sm:$0xff]  }
 0x179   : > { %4557 = vmatprep.subr.bf16.mxu0 %v5017_v3  ;;  %v5059_v3 = vld [vmem:[%s5706_s29 + $0x130] sm:$0xff]  }
 0x17a   : > { %4578 = vmatpush3.bf16.msra.mxu1 %v5016_v4  ;;  %v5061_v4 = vld [vmem:[%s5706_s29 + $0x178] sm:$0xff]  }
 0x17b   : > { %4579 = vmatprep.subr.bf16.mxu1 %v5018_v5  ;;  %v5060_v5 = vld [vmem:[%s5706_s29 + $0x1b0] sm:$0xff]  }
 0x17c   : > { %4558 = vmatpush3.bf16.msra.mxu0 %v5019_v6  ;;  %v2156_v6 = vunpack.i.h.s16 %v2149_v1 }
 0x17d   : > { %4559 = vmatprep.subr.bf16.mxu0 %v5021_v7  ;;  %v5062_v7 = vld [vmem:[%s5706_s29 + $0x1f8] sm:$0xff]  }
 0x17e   : > { %4580 = vmatpush3.bf16.msra.mxu1 %v5020_v48  ;;  %v5063_v48 = vld [vmem:[%s5706_s29 + $0x138] sm:$0xff]  }
 0x17f   : > { %4581 = vmatprep.subr.bf16.mxu1 %v5022_v8  ;;  %v6031_v8 = vpack.i.b16 %v2149_v1, %v2149_v1  ;;  %v5099_v1 = vld [vmem:[%s5706_s29 + $0x300] sm:$0xff]  }
 0x180   : > { %4560 = vmatpush3.bf16.msra.mxu0 %v5023_v10  ;;  %v5065_v10 = vld [vmem:[%s5706_s29 + $0x240] sm:$0xff]  }
 0x181   : > { %4561 = vmatprep.subr.bf16.mxu0 %v5025_v12  ;;  %v6035_v12 = vpack.i.b16 %v2156_v6, %v2156_v6 }
 0x182   : > { %4582 = vmatpush3.bf16.msra.mxu1 %v5024_v13  ;;  %v5129_v13 = vld [vmem:[%s5712_s25] sm:$0xff] }
 0x183   : > { %4583 = vmatprep.subr.bf16.mxu1 %v5026_v16  ;;  %v3617_v14 = vunpack.c.l.bf16 %v5129_v13  ;;  %v3618_v15 = vunpack.c.h.bf16 %v5129_v13  ;;  %v2713_v16 = vrot.slane %v5987_v28, %v5786_v44  ;;  %v5071_v28 = vld [vmem:[%s5706_s29 + $0x208] sm:$0xff]   ;;  %v5108_v13 = vld [vmem:[%s5706_s29 + $0x390] sm:$0xff]  }
 0x184   : > { %4562 = vmatpush3.bf16.msra.mxu0 %v5027_v17  ;;  %v5066_v17 = vld [vmem:[%s5706_s29 + $0x2c0] sm:$0xff]  }
 0x185   : > { %4563 = vmatprep.subr.bf16.mxu0 %v5029_v21  ;;  %v5067_v21 = vld [vmem:[%s5706_s29 + $0x200] sm:$0xff]   ;;  %v3619_v23 = vadd.f32 %v3618_v15, %v3617_v14  ;;  %v5110_v14 = vld [vmem:[%s5706_s29 + $0x3d8] sm:$0xff]  }
 0x186   : > { %4584 = vmatpush3.bf16.msra.mxu1 %v5028_v22  ;;  %v3011_v22 = vrot.slane %v6031_v8, %v5788_v45  ;;  %v5111_v15 = vld [vmem:[%s5706_s29 + $0x318] sm:$0xff]  }
 0x187   : > { %4585 = vmatprep.subr.bf16.mxu1 %v5030_v25  ;;  %v5069_v25 = vld [vmem:[%s5706_s29 + $0x248] sm:$0xff]   ;;  %3620 = vadd.xlane.f32.xlu0 %v3619_v23 }
 0x188   : > { %4564 = vmatpush3.bf16.msra.mxu0 %v5031_v27  ;;  %v3158_v27 = vrot.slane %v6035_v12, %v5788_v45  ;;  %v5118_v23 = vld [vmem:[%s5706_s29 + $0x3e8] sm:$0xff]  }
 0x189   : > { %4593 = vmatprep.subr.bf16.mxu0 %v5033_v29  ;;  %v5073_v29 = vld [vmem:[%s5706_s29 + $0x250] sm:$0xff]  }
 0x18a   : > { %4586 = vmatpush3.bf16.msra.mxu1 %v5032_v31  ;;  %v5072_v31 = vld [vmem:[%s5706_s29 + $0x288] sm:$0xff]  }
 0x18b   : > { %2555 = vmatmul.mubr.bf16.vlgmr.msra.gmra.mrb[16].mxu0 %v2419_v33  ;;  %4615 = vmatprep.subr.bf16.mxu1 %v5034_v34  ;;  %v5075_v33 = vld [vmem:[%s5706_s29 + $0x210] sm:$0xff]   ;;  %v5077_v34 = vld [vmem:[%s5706_s29 + $0x258] sm:$0xff]  }
 0x18c   : > { %4594 = vmatpush3.bf16.msra.mxu0 %v5035_v35  ;;  %2848 = vmatprep.mubr.bf16.mxu0 %v2717_v36  ;;  %v5076_v35 = vld [vmem:[%s5706_s29 + $0x290] sm:$0xff]   ;;  %v5078_v36 = vld [vmem:[%s5706_s29 + $0x2d8] sm:$0xff]  }
 0x18d   : > { %2702 = vmatmul.mubr.bf16.vlgmr.msra.gmra.mrb[16].mxu1 %v2566_v37  ;;  %4595 = vmatprep.subr.bf16.mxu0 %v5037_v38  ;;  %v5079_v37 = vld [vmem:[%s5706_s29 + $0x218] sm:$0xff]   ;;  %v5081_v38 = vld [vmem:[%s5706_s29 + $0x260] sm:$0xff]  }
 0x18e   : > { %4616 = vmatpush3.bf16.msra.mxu1 %v5036_v39  ;;  %2995 = vmatprep.mubr.bf16.mxu1 %v2864_v40  ;;  %v5080_v39 = vld [vmem:[%s5706_s29 + $0x298] sm:$0xff]   ;;  %v5082_v40 = vld [vmem:[%s5706_s29 + $0x2e0] sm:$0xff]  }
 0x18f   : > { %4617 = vmatprep.subr.bf16.mxu1 %v5038_v42  ;;  %3629 = vadd.xlane.f32.xlu0 %v3628_v41  ;;  %v5083_v42 = vld [vmem:[%s5706_s29 + $0x220] sm:$0xff]   ;;  %v5122_v41 = vld [vmem:[%s5706_s29 + $0x3f0] sm:$0xff]  }
 0x190   : > { %4596 = vmatpush3.bf16.msra.mxu0 %v5039_v43  ;;  %v5085_v43 = vld [vmem:[%s5706_s29 + $0x268] sm:$0xff]  }
 0x191   : > { %4597 = vmatprep.subr.bf16.mxu0 %v5041_v46  ;;  %v5084_v46 = vld [vmem:[%s5706_s29 + $0x2a0] sm:$0xff]  }
 0x192   : > { %4618 = vmatpush3.bf16.msra.mxu1 %v5040_v47  ;;  %v5086_v47 = vld [vmem:[%s5706_s29 + $0x2e8] sm:$0xff]  }
 0x193   : > { %4619 = vmatprep.subr.bf16.mxu1 %v5042_v49  ;;  %v5087_v49 = vld [vmem:[%s5706_s29 + $0x228] sm:$0xff]  }
 0x194   : > { %4598 = vmatpush3.bf16.msra.mxu0 %v5043_v50  ;;  %v5089_v50 = vld [vmem:[%s5706_s29 + $0x270] sm:$0xff]  }
 0x195   : > { %4599 = vmatprep.subr.bf16.mxu0 %v5045_v51  ;;  %v5088_v51 = vld [vmem:[%s5706_s29 + $0x2a8] sm:$0xff]  }
 0x196   : > { %4620 = vmatpush3.bf16.msra.mxu1 %v5044_v52  ;;  %v2150_v52 = vcombine.high %v5976_v20, %v5976_v20  ;;  %v5097_v20 = vld [vmem:[%s5706_s29 + $0x340] sm:$0xff]  }
 0x197   : > { %4621 = vmatprep.subr.bf16.mxu1 %v5046_v53  ;;  %v5090_v53 = vld [vmem:[%s5706_s29 + $0x2f0] sm:$0xff]  }
 0x198   : > { %4600 = vmatpush3.bf16.msra.mxu0 %v5047_v54  ;;  %v5091_v54 = vld [vmem:[%s5706_s29 + $0x230] sm:$0xff]  }
 0x199   : > { %4601 = vmatprep.subr.bf16.mxu0 %v5049_v55  ;;  %v5093_v55 = vld [vmem:[%s5706_s29 + $0x278] sm:$0xff]  }
 0x19a   : > { %4622 = vmatpush3.bf16.msra.mxu1 %v5048_v56  ;;  %v5092_v56 = vld [vmem:[%s5706_s29 + $0x2b0] sm:$0xff]  }
 0x19b   : > { %4623 = vmatprep.subr.bf16.mxu1 %v5050_v57  ;;  %v2158_v57 = vunpack.i.h.s16 %v2150_v52 }
 0x19c   : > { %4602 = vmatpush3.bf16.msra.mxu0 %v5051_v58  ;;  %v5094_v58 = vld [vmem:[%s5706_s29 + $0x2f8] sm:$0xff]  }
 0x19d   : > { %4603 = vmatprep.subr.bf16.mxu0 %v5053_v59  ;;  %v5095_v59 = vld [vmem:[%s5706_s29 + $0x238] sm:$0xff]  }
 0x19e   : > { %4624 = vmatpush3.bf16.msra.mxu1 %v5052_v60  ;;  %v6080_v60 = vpack.i.b16 %v2150_v52, %v2150_v52 }
 0x19f   : > { %4625 = vmatprep.subr.bf16.mxu1 %v5054_v61  ;;  %v5096_v61 = vld [vmem:[%s5706_s29 + $0x2b8] sm:$0xff]  }
 0x1a0   : > { %4604 = vmatpush3.bf16.msra.mxu0 %v5055_v62  ;;  %v6084_v62 = vpack.i.b16 %v2158_v57, %v2158_v57 }
 0x1a1   : > { %4605 = vmatprep.subr.bf16.mxu0 %v5057_v63  ;;  %v3007_v63 = vrot.slane %v6031_v8, %v5786_v44  ;;  %v5105_v8 = vld [vmem:[%s5706_s29 + $0x350] sm:$0xff]  }
 0x1a2   : > { %4626 = vmatpush3.bf16.msra.mxu1 %v5056_v0  ;;  %v5098_v0 = vld [vmem:[%s5706_s29 + $0x3c0] sm:$0xff]   ;;  %v3452_v6 = vrot.slane %v6084_v62, %v5788_v45 }
 0x1a3   : > { %4627 = vmatprep.subr.bf16.mxu1 %v5058_v2  ;;  %v3305_v2 = vrot.slane %v6080_v60, %v5788_v45  ;;  %v5106_v45 = vld [vmem:[%s5706_s29 + $0x3d0] sm:$0xff]  }
 0x1a4   : > { %4606 = vmatpush3.bf16.msra.mxu0 %v5059_v3  ;;  %v3154_v3 = vrot.slane %v6035_v12, %v5786_v44  ;;  %v5109_v12 = vld [vmem:[%s5706_s29 + $0x358] sm:$0xff]  }
 0x1a5   : > { %4607 = vmatprep.subr.bf16.mxu0 %v5061_v4  ;;  %v5101_v4 = vld [vmem:[%s5706_s29 + $0x348] sm:$0xff]  }
 0x1a6   : > { %4628 = vmatpush3.bf16.msra.mxu1 %v5060_v5  ;;  %v5100_v5 = vld [vmem:[%s5706_s29 + $0x380] sm:$0xff]  }
 0x1a7   : > { %4629 = vmatprep.subr.bf16.mxu1 %v5062_v7  ;;  %v5102_v7 = vld [vmem:[%s5706_s29 + $0x3c8] sm:$0xff]  }
 0x1a8   : > { %4608 = vmatpush3.bf16.msra.mxu0 %v5063_v48  ;;  %v5103_v48 = vld [vmem:[%s5706_s29 + $0x308] sm:$0xff]  }
 0x1a9   : > { %4637 = vmatprep.subr.bf16.mxu0 %v5065_v10  ;;  %v5104_v10 = vld [vmem:[%s5706_s29 + $0x388] sm:$0xff]  }
 0x1aa   : > { %4630 = vmatpush3.bf16.msra.mxu1 %v5064_v11  ;;  %v5107_v11 = vld [vmem:[%s5706_s29 + $0x310] sm:$0xff]  }
 0x1ab   : > { %2849 = vmatmul.mubr.bf16.vlgmr.msra.gmra.mrb[20].mxu0 %v2713_v16  ;;  %4659 = vmatprep.subr.bf16.mxu1 %v5066_v17  ;;  %v5113_v16 = vld [vmem:[%s5706_s29 + $0x360] sm:$0xff]   ;;  %v5112_v17 = vld [vmem:[%s5706_s29 + $0x398] sm:$0xff]  }
 0x1ac   : > { %4638 = vmatpush3.bf16.msra.mxu0 %v5067_v21  ;;  %3142 = vmatprep.mubr.bf16.mxu0 %v3011_v22  ;;  %v5117_v21 = vld [vmem:[%s5706_s29 + $0x368] sm:$0xff]   ;;  %v5116_v22 = vld [vmem:[%s5706_s29 + $0x3a0] sm:$0xff]  }
 0x1ad   : > { %2996 = vmatmul.mubr.bf16.vlgmr.msra.gmra.mrb[20].mxu1 %v2860_v24  ;;  %4639 = vmatprep.subr.bf16.mxu0 %v5069_v25  ;;  %v5119_v24 = vld [vmem:[%s5706_s29 + $0x328] sm:$0xff]   ;;  %v5121_v25 = vld [vmem:[%s5706_s29 + $0x370] sm:$0xff]  }
 0x1ae   : > { %4660 = vmatpush3.bf16.msra.mxu1 %v5068_v26  ;;  %3289 = vmatprep.mubr.bf16.mxu1 %v3158_v27  ;;  %v5120_v27 = vld [vmem:[%s5706_s29 + $0x3a8] sm:$0xff]  }
 0x1af   : > { %4661 = vmatprep.subr.bf16.mxu1 %v5070_v9 }
 0x1b0   : > { %4640 = vmatpush3.bf16.msra.mxu0 %v5071_v28 }
 0x1b1   : > { %4641 = vmatprep.subr.bf16.mxu0 %v5073_v29 }
 0x1b2   : > { %4662 = vmatpush3.bf16.msra.mxu1 %v5072_v31 }
 0x1b3   : > { %4663 = vmatprep.subr.bf16.mxu1 %v5074_v32  ;;  %v5123_v32 = vld [vmem:[%s5706_s29 + $0x330] sm:$0xff]  }
 0x1b4   : > { %4642 = vmatpush3.bf16.msra.mxu0 %v5075_v33 }
 0x1b5   : > { %4643 = vmatprep.subr.bf16.mxu0 %v5077_v34 }
 0x1b6   : > { %4664 = vmatpush3.bf16.msra.mxu1 %v5076_v35  ;;  %v5125_v35 = vld [vmem:[%s5706_s29 + $0x378] sm:$0xff]  }
 0x1b7   : > { %4665 = vmatprep.subr.bf16.mxu1 %v5078_v36 }
 0x1b8   : > { %4644 = vmatpush3.bf16.msra.mxu0 %v5079_v37 }
 0x1b9   : > { %4645 = vmatprep.subr.bf16.mxu0 %v5081_v38  ;;  %v5124_v38 = vld [vmem:[%s5706_s29 + $0x3b0] sm:$0xff]  }
 0x1ba   : > { %4666 = vmatpush3.bf16.msra.mxu1 %v5080_v39 }
 0x1bb   : > { %4667 = vmatprep.subr.bf16.mxu1 %v5082_v40  ;;  %v5126_v40 = vld [vmem:[%s5706_s29 + $0x3f8] sm:$0xff]  }
 0x1bc   : > { %4646 = vmatpush3.bf16.msra.mxu0 %v5083_v42 }
 0x1bd   : > { %4647 = vmatprep.subr.bf16.mxu0 %v5085_v43  ;;  %v5127_v43 = vld [vmem:[%s5706_s29 + $0x338] sm:$0xff]  }
 0x1be   : > { %4668 = vmatpush3.bf16.msra.mxu1 %v5084_v46 }
 0x1bf   : > { %4669 = vmatprep.subr.bf16.mxu1 %v5086_v47  ;;  %v5128_v47 = vld [vmem:[%s5706_s29 + $0x3b8] sm:$0xff]  }
 0x1c0   : > { %4648 = vmatpush3.bf16.msra.mxu0 %v5087_v49  ;;  %v3301_v49 = vrot.slane %v6080_v60, %v5786_v44 }
 0x1c1   : > { %4649 = vmatprep.subr.bf16.mxu0 %v5089_v50  ;;  %v3448_v50 = vrot.slane %v6084_v62, %v5786_v44 }
 0x1c2   : > { %4670 = vmatpush3.bf16.msra.mxu1 %v5088_v51 }
 0x1c3   : > { %4671 = vmatprep.subr.bf16.mxu1 %v5090_v53 }
 0x1c4   : > { %4650 = vmatpush3.bf16.msra.mxu0 %v5091_v54 }
 0x1c5   : > { %4651 = vmatprep.subr.bf16.mxu0 %v5093_v55 }
 0x1c6   : > { %4672 = vmatpush3.bf16.msra.mxu1 %v5092_v56 }
 0x1c7   : > { %4673 = vmatprep.subr.bf16.mxu1 %v5094_v58 }
 0x1c8   : > { %4652 = vmatpush3.bf16.msra.mxu0 %v5095_v59 }
 0x1c9   : > { %4681 = vmatprep.subr.bf16.mxu0 %v5097_v20 }
 0x1ca   : > { %4674 = vmatpush3.bf16.msra.mxu1 %v5096_v61 }
 0x1cb   : > { %3143 = vmatmul.mubr.bf16.vlgmr.msra.gmra.mrb[24].mxu0 %v3007_v63  ;;  %4703 = vmatprep.subr.bf16.mxu1 %v5098_v0 }
 0x1cc   : > { %4682 = vmatpush3.bf16.msra.mxu0 %v5099_v1  ;;  %3436 = vmatprep.mubr.bf16.mxu0 %v3305_v2 }
 0x1cd   : > { %3290 = vmatmul.mubr.bf16.vlgmr.msra.gmra.mrb[24].mxu1 %v3154_v3  ;;  %4683 = vmatprep.subr.bf16.mxu0 %v5101_v4 }
 0x1ce   : > { %4704 = vmatpush3.bf16.msra.mxu1 %v5100_v5  ;;  %3583 = vmatprep.mubr.bf16.mxu1 %v3452_v6 }
 0x1cf   : > { %4705 = vmatprep.subr.bf16.mxu1 %v5102_v7 }
 0x1d0   : > { %4684 = vmatpush3.bf16.msra.mxu0 %v5103_v48 }
 0x1d1   : > { %4685 = vmatprep.subr.bf16.mxu0 %v5105_v8 }
 0x1d2   : > { %4706 = vmatpush3.bf16.msra.mxu1 %v5104_v10 }
 0x1d3   : > { %4707 = vmatprep.subr.bf16.mxu1 %v5106_v45 }
 0x1d4   : > { %4686 = vmatpush3.bf16.msra.mxu0 %v5107_v11 }
 0x1d5   : > { %4687 = vmatprep.subr.bf16.mxu0 %v5109_v12 }
 0x1d6   : > { %4708 = vmatpush3.bf16.msra.mxu1 %v5108_v13 }
 0x1d7   : > { %4709 = vmatprep.subr.bf16.mxu1 %v5110_v14 }
 0x1d8   : > { %4688 = vmatpush3.bf16.msra.mxu0 %v5111_v15 }
 0x1d9   : > { %4689 = vmatprep.subr.bf16.mxu0 %v5113_v16 }
 0x1da   : > { %4710 = vmatpush3.bf16.msra.mxu1 %v5112_v17 }
 0x1db   : > { %4711 = vmatprep.subr.bf16.mxu1 %v5114_v18 }
 0x1dc   : > { %4690 = vmatpush3.bf16.msra.mxu0 %v5115_v19 }
 0x1dd   : > { %4691 = vmatprep.subr.bf16.mxu0 %v5117_v21 }
 0x1de   : > { %4712 = vmatpush3.bf16.msra.mxu1 %v5116_v22  ;;  %v4389_v26 = vpop.f32.mrb[0].mxu0 }
 0x1df   : > { %v4390_v9 = vpop.f32.mrb[1].mxu0  ;;  %4713 = vmatprep.subr.bf16.mxu1 %v5118_v23  ;;  %v4411_v28 = vpop.f32.mrb[0].mxu1 }
 0x1e0   : > { %v4391_v29 = vadd.f32 %v4390_v9, %v4389_v26  ;;  %v4392_v31 = vpop.f32.mrb[2].mxu0  ;;  %4692 = vmatpush3.bf16.msra.mxu0 %v5119_v24  ;;  %v4412_v33 = vpop.f32.mrb[1].mxu1  ;;  %v3616_v24 = vld [vmem:[#allocation4] sm:$0xff] }
 0x1e1   : > { %v4393_v34 = vpop.f32.mrb[3].mxu0  ;;  %4693 = vmatprep.subr.bf16.mxu0 %v5121_v25  ;;  %v4413_v36 = vadd.f32 %v4412_v33, %v4411_v28  ;;  %v4414_v37 = vpop.f32.mrb[2].mxu1  ;;  %v3625_v31 = vld [vmem:[#allocation5] sm:$0xff] }
 0x1e2   : > { %4714 = vmatpush3.bf16.msra.mxu1 %v5120_v27  ;;  %v4415_v39 = vpop.f32.mrb[3].mxu1  ;;  %v627_v27 = vld [vmem:[#allocation2] sm:$0xff] }
 0x1e3   : > { %4715 = vmatprep.subr.bf16.mxu1 %v5122_v41  ;;  %v2101_v42 = vrot.slane %v4413_v36, 7 }
 0x1e4   : > { %4694 = vmatpush3.bf16.msra.mxu0 %v5123_v32 }
 0x1e5   : > { %4695 = vmatprep.subr.bf16.mxu0 %v5125_v35  ;;  %v2103_v46 = vsel %vm2102_vm1, %v2101_v42, %v4391_v29 }
 0x1e6   : > { %4716 = vmatpush3.bf16.msra.mxu1 %v5124_v38 }
 0x1e7   : > { %4717 = vmatprep.subr.bf16.mxu1 %v5126_v40 }
 0x1e8   : > { %4696 = vmatpush3.bf16.msra.mxu0 %v5127_v43 }
 0x1ea   : > { %4718 = vmatpush3.bf16.msra.mxu1 %v5128_v47 }
 0x1eb   : > { %3437 = vmatmul.mubr.bf16.vlgmr.msra.gmra.mrb[28].mxu0 %v3301_v49 }
 0x1ed   : > { %3584 = vmatmul.mubr.bf16.vlgmr.msra.gmra.mrb[28].mxu1 %v3448_v50 }
 0x1fe   : > { %v4433_v51 = vpop.f32.mrb[4].mxu0 }
 0x1ff   : > { %v4434_v52 = vpop.f32.mrb[5].mxu0 }
 0x200   : > { %v4455_v53 = vpop.f32.mrb[4].mxu1  ;;  %v4435_v54 = vadd.f32 %v4434_v52, %v4433_v51  ;;  %v4436_v55 = vpop.f32.mrb[6].mxu0 }
 0x201   : > { %v4456_v56 = vpop.f32.mrb[5].mxu1  ;;  %v4437_v57 = vpop.f32.mrb[7].mxu0 }
 0x202   : > { %v2104_v58 = vrot.slane %v4435_v54, 6  ;;  %v4457_v59 = vadd.f32 %v4456_v56, %v4455_v53  ;;  %v4458_v20 = vpop.f32.mrb[6].mxu1 }
 0x203   : > { %v4459_v60 = vpop.f32.mrb[7].mxu1 }
 0x204   : > { %v2106_v61 = vsel %vm2105_vm2, %v2104_v58, %v2103_v46  ;;  %v2107_v63 = vrot.slane %v4457_v59, 5 }
 0x206   : > { %v2109_v44 = vsel %vm2108_vm3, %v2107_v63, %v2106_v61 }
 0x214   : > { %v3621_v25 = vpop.xlane.xlu0 %3620 }
 0x215   : > { %v3622_v41 = vadd.f32 %v3621_v25, %v3616_v24  ;;  %v2125_v24 = vld [vmem:[#allocation3] sm:$0xff] }
 0x217   : > { %3624 = vst.msk [vmem:[#allocation4] sm:$0xff] %vm3623_vm8, %v3622_v41 }
 0x21c   : > { %v3630_v32 = vpop.xlane.xlu0 %3629 }
 0x21d   : > { %v3631_v33 = vadd.f32 %v3630_v32, %v3625_v31  ;;  %v3657_v32 = vld [vmem:[#allocation13] sm:$0x3] (!%p4366_p10) }
 0x21e   : > { %v4477_v62 = vpop.f32.mrb[8].mxu0 }
 0x21f   : > { %v4478_v0 = vpop.f32.mrb[9].mxu0  ;;  %3632 = vst.msk [vmem:[#allocation5] sm:$0xff] %vm3623_vm8, %v3631_v33  ;;  %v5385_v33 = vmov (!%p4366_p10), 0.0  }
 0x220   : > { %v4499_v1 = vpop.f32.mrb[8].mxu1  ;;  %v4479_v2 = vadd.f32 %v4478_v0, %v4477_v62  ;;  %v4480_v3 = vpop.f32.mrb[10].mxu0  ;;  %4734 = vmatprep.subr.mxu1 (!%p4366_p10), %v5385_v33  ;;  %4736 = vmatprep.mubr.msk.f32.mxu1 (!%p4366_p10), %vm5386_vm9, %v5385_v33 }
 0x221   : > { %v4500_v4 = vpop.f32.mrb[9].mxu1  ;;  %v4481_v5 = vpop.f32.mrb[11].mxu0  ;;  %4735 = vmatpush3.xpose.msra.mxu1 (!%p4366_p10), %v3657_v32  ;;  %4729 = vmatprep.subr.mxu0 (!%p4366_p10), %v5385_v33 }
 0x222   : > { %v2110_v6 = vrot.slane %v4479_v2, 4  ;;  %v4501_v7 = vadd.f32 %v4500_v4, %v4499_v1  ;;  %v4502_v48 = vpop.f32.mrb[10].mxu1  ;;  %4731 = vmatprep.mubr.msk.f32.mxu0 (!%p4366_p10), %vm5386_vm9, %v5385_v33 }
 0x223   : > { %v4503_v8 = vpop.f32.mrb[11].mxu1 }
 0x224   : > { %v2112_v10 = vsel %vm2111_vm4, %v2110_v6, %v2109_v44  ;;  %v2113_v45 = vrot.slane %v4501_v7, 3 }
 0x226   : > { %v2115_v11 = vsel %vm2114_vm5, %v2113_v45, %v2112_v10  ;;  %v3648_v41 = vld [vmem:[#allocation5] sm:$0xff] (!%p4366_p10) }
 0x227   : > { %v3649_v31 = vmax.f32 (!%p4366_p10), %v3648_v41, 1e-09 }
 0x23e   : > { %v4521_v12 = vpop.f32.mrb[12].mxu0 }
 0x23f   : > { %v4522_v13 = vpop.f32.mrb[13].mxu0 }
 0x240   : > { %v4543_v14 = vpop.f32.mrb[12].mxu1  ;;  %v4523_v15 = vadd.f32 %v4522_v13, %v4521_v12  ;;  %v4524_v16 = vpop.f32.mrb[14].mxu0 }
 0x241   : > { %v4544_v17 = vpop.f32.mrb[13].mxu1  ;;  %v4525_v18 = vpop.f32.mrb[15].mxu0 }
 0x242   : > { %v2116_v19 = vrot.slane %v4523_v15, 2  ;;  %v4545_v21 = vadd.f32 %v4544_v17, %v4543_v14  ;;  %v4546_v22 = vpop.f32.mrb[14].mxu1 }
 0x243   : > { %v4547_v23 = vpop.f32.mrb[15].mxu1 }
 0x244   : > { %v2118_v26 = vsel %vm2117_vm6, %v2116_v19, %v2115_v11  ;;  %v2119_v9 = vrot.slane %v4545_v21, 1 }
 0x246   : > { %v2121_v28 = vsel %vm2120_vm7, %v2119_v9, %v2118_v26  ;;  %v3638_v9 = vld [vmem:[#allocation4] sm:$0xff] (!%p4366_p10) }
 0x247   : > { %v2123_v29 = vadd.f32 %v2121_v28, %v627_v27  ;;  %v5384_v28 = vmov (!%p4366_p10), 0  }
 0x248   : > { %5130 = vset.pattern.permute.xlu0 (!%p4366_p10), %v5384_v28  ;;  %5131 = vset.pattern.permute.xlu1 (!%p4366_p10), %v5384_v28 }
 0x249   : > { %2124 = vst [vmem:[#allocation2] sm:$0xff] %v2123_v29  ;;  %v3639_v29 = vmax.f32 (!%p4366_p10), %v3638_v9, 1e-09 }
 0x24b   : > { %3642 = vperm.xlu0 (!%p4366_p10), %5130, %v3639_v29  }
 0x24f   : > { %3652 = vperm.xlu0 (!%p4366_p10), %5130, %v3649_v31  }
 0x25e   : > { %v4565_v34 = vpop.f32.mrb[16].mxu0 }
 0x25f   : > { %v4566_v35 = vpop.f32.mrb[17].mxu0 }
 0x260   : > { %v4587_v36 = vpop.f32.mrb[16].mxu1  ;;  %v4567_v37 = vadd.f32 %v4566_v35, %v4565_v34  ;;  %v4568_v38 = vpop.f32.mrb[18].mxu0  ;;  %v3658_v34 = vld [vmem:[#allocation14] sm:$0x3] (!%p4366_p10) }
 0x261   : > { %v4588_v39 = vpop.f32.mrb[17].mxu1  ;;  %v4569_v40 = vpop.f32.mrb[19].mxu0  ;;  %4730 = vmatpush3.xpose.msra.mxu0 (!%p4366_p10), %v3658_v34 }
 0x262   : > { %v4589_v42 = vadd.f32 %v4588_v39, %v4587_v36  ;;  %v4590_v43 = vpop.f32.mrb[18].mxu1 }
 0x263   : > { %v4591_v46 = vpop.f32.mrb[19].mxu1 }
 0x264   : > { %v3599_v47 = vrot.slane %v4589_v42, 7 }
 0x266   : > { %v3600_v49 = vsel %vm2102_vm1, %v3599_v47, %v4567_v37  ;;  %v3637_v37 = vld [vmem:[#allocation2] sm:$0xff] (!%p4366_p10) }
 0x27e   : > { %v4609_v50 = vpop.f32.mrb[20].mxu0 }
 0x27f   : > { %v4610_v51 = vpop.f32.mrb[21].mxu0 }
 0x280   : > { %v4631_v52 = vpop.f32.mrb[20].mxu1  ;;  %v4611_v53 = vadd.f32 %v4610_v51, %v4609_v50  ;;  %v4612_v54 = vpop.f32.mrb[22].mxu0  ;;  %v4367_v50 = vld [vmem:[#allocation16] ss:$0 sm:$0xff] (!%p4366_p10) }
 0x281   : > { %v4632_v55 = vpop.f32.mrb[21].mxu1  ;;  %v4613_v56 = vpop.f32.mrb[23].mxu0 }
 0x282   : > { %v3601_v57 = vrot.slane %v4611_v53, 6  ;;  %v4633_v58 = vadd.f32 %v4632_v55, %v4631_v52  ;;  %v4634_v59 = vpop.f32.mrb[22].mxu1  ;;  %v3821_v55 = vld [vmem:[%s606_s19] sm:$0xff] (!%p4366_p10) }
 0x283   : > { %v4635_v20 = vpop.f32.mrb[23].mxu1 }
 0x284   : > { %v3602_v60 = vsel %vm2105_vm2, %v3601_v57, %v3600_v49  ;;  %v3603_v61 = vrot.slane %v4633_v58, 5  ;;  %v3823_v58 = vand.u32 (!%p4366_p10), 127, %v632_v30 }
 0x286   : > { %v3604_v63 = vsel %vm2108_vm3, %v3603_v61, %v3602_v60 }
 0x29e   : > { %v4653_v44 = vpop.f32.mrb[24].mxu0 }
 0x29f   : > { %v4654_v62 = vpop.f32.mrb[25].mxu0 }
 0x2a0   : > { %v4675_v0 = vpop.f32.mrb[24].mxu1  ;;  %v4655_v1 = vadd.f32 %v4654_v62, %v4653_v44  ;;  %v4656_v2 = vpop.f32.mrb[26].mxu0 }
 0x2a1   : > { %v4676_v3 = vpop.f32.mrb[25].mxu1  ;;  %v4657_v4 = vpop.f32.mrb[27].mxu0 }
 0x2a2   : > { %v3605_v5 = vrot.slane %v4655_v1, 4  ;;  %v4677_v6 = vadd.f32 %v4676_v3, %v4675_v0  ;;  %v4678_v7 = vpop.f32.mrb[26].mxu1 }
 0x2a3   : > { %v4679_v48 = vpop.f32.mrb[27].mxu1 }
 0x2a4   : > { %v3606_v8 = vsel %vm2111_vm4, %v3605_v5, %v3604_v63  ;;  %v3607_v10 = vrot.slane %v4677_v6, 3 }
 0x2a6   : > { %v3608_v45 = vsel %vm2114_vm5, %v3607_v10, %v3606_v8 }
 0x2be   : > { %v4697_v11 = vpop.f32.mrb[28].mxu0 }
 0x2bf   : > { %v4698_v12 = vpop.f32.mrb[29].mxu0 }
 0x2c0   : > { %v4719_v13 = vpop.f32.mrb[28].mxu1  ;;  %v4699_v14 = vadd.f32 %v4698_v12, %v4697_v11  ;;  %v4700_v15 = vpop.f32.mrb[30].mxu0 }
 0x2c1   : > { %v4720_v16 = vpop.f32.mrb[29].mxu1  ;;  %v4701_v17 = vpop.f32.mrb[31].mxu0 }
 0x2c2   : > { %v3609_v18 = vrot.slane %v4699_v14, 2  ;;  %v4721_v19 = vadd.f32 %v4720_v16, %v4719_v13  ;;  %v4722_v21 = vpop.f32.mrb[30].mxu1 }
 0x2c3   : > { %v4723_v22 = vpop.f32.mrb[31].mxu1  ;;  %3636 = sbr.rel (%p4366_p10) target bundleno = 1267 (0x4f3), region = 88 }
 0x2c4   : > { %v3610_v23 = vsel %vm2117_vm6, %v3609_v18, %v3608_v45  ;;  %v3611_v25 = vrot.slane %v4721_v19, 1 }
 0x2c6   : > { %v3612_v26 = vsel %vm2120_vm7, %v3611_v25, %v3610_v23 }
 0x2c7   : > { %v3614_v27 = vadd.f32 %v3612_v26, %v2125_v24 }
 0x2c9   : > { %3615 = vst [vmem:[#allocation3] sm:$0xff] %v3614_v27 }
 0x2ca   : > { %v3643_v35 = vpop.permute.xlu0 %3642 }
 0x2cb   : > { %5132 = vrcp.f32 %v3643_v35 }
 0x2ce   : > { %v3653_v36 = vpop.permute.xlu0 %3652 }
 0x2cf   : > { %5134 = vrcp.f32 %v3653_v36 }
 0x2d0   : > { %v3647_v40 = vld [vmem:[#allocation3] sm:$0xff] }
 0x2d5   : > { %v5133_v38 = vpop.eup %5132 }
 0x2d6   : > { %v3646_v39 = vmul.f32 %v5133_v38, %v3637_v37 }
 0x2d8   : > { %4737 = vmatmul.mubr.f32.vlgmr.msra.gmra.mrb[0].mxu1 %v3646_v39 }
 0x2d9   : > { %v5135_v42 = vpop.eup %5134 }
 0x2da   : > { %v3656_v43 = vmul.f32 %v5135_v42, %v3647_v40 }
 0x2dc   : > { %4732 = vmatmul.mubr.f32.vlgmr.msra.gmra.mrb[0].mxu0 %v3656_v43 }
 0x3ab   : > { %v3795_v46 = vpop.f32.mrb[0].mxu1 }
 0x3ac   : > { %v4738_v47 = vpop.f32.mrb[1].mxu1 }
 0x3af   : > { %v3725_v49 = vpop.f32.mrb[0].mxu0 }
 0x3b0   : > { %v3796_v51 = vadd.f32 %v3795_v46, %v3725_v49  ;;  %v4733_v52 = vpop.f32.mrb[1].mxu0 }
 0x3b2   : > { %v3806_v53 = vadd.f32 %v4367_v50, %v3796_v51 }
 0x3b4   : > { %v3809_v54 = vsel %vm3807_vm10, %v3806_v53, -inf  ;;  %3808 = vst.msk [vmem:[%s610_s21] sm:$0xff] %vm3807_vm10, %v3806_v53 }
 0x3b5   : > { %3810 = vmax.xlane.f32.xlu1 %v3809_v54 }
 0x3c6   : > { %3825 = vperm.xlu1 %5131, %v3821_v55  }
 0x442   : > { %v3811_v56 = vpop.xlane.xlu1 %3810 }
 0x443   : > { %v3812_v57 = vsub.f32 %v3806_v53, %v3811_v56 }
 0x445   : > { %v3813_v59 = vmul.f32 1.442695, %v3812_v57 }
 0x446   : > { %v3826_v20 = vpop.permute.xlu1 %3825 }
 0x447   : > { %5136 = vpow2.f32 %v3813_v59  ;;  %vm3827_vm11 = vcmp.eq.s32.totalorder %v3823_v58, %v3826_v20 }
 0x448   : > { %v4368_v60 = vsel %vm3827_vm11, 1.0, %v5385_v33 }
 0x449   : > { %v3830_v61 = vmul.f32 %v4368_v60, %v3806_v53 }
 0x44b   : > { %v3831_v63 = vsel %vm3807_vm10, %v3830_v61, 0.0 }
 0x44c   : > { %3832 = vadd.xlane.f32.xlu1 %v3831_v63 }
 0x451   : > { %v5137_v44 = vpop.eup %5136 }
 0x452   : > { %v3815_v62 = vsel %vm3807_vm10, %v5137_v44, 0.0 }
 0x453   : > { %3816 = vadd.xlane.f32.xlu0 %v3815_v62 }
 0x4d9   : > { %v3833_v30 = vpop.xlane.xlu1 %3832 }
 0x4e0   : > { %v3817_v0 = vpop.xlane.xlu0 %3816 }
 0x4e1   : > { %5138 = vlog2.f32 %v3817_v0 }
 0x4eb   : > { %v5139_v1 = vpop.eup %5138 }
 0x4ec   : > { %v3819_v2 = vmul.f32 0.6931472, %v5139_v1 }
 0x4ee   : > { %v3820_v3 = vadd.f32 %v3819_v2, %v3811_v56 }
 0x4f0   : > { %v3834_v4 = vsub.f32 %v3820_v3, %v3833_v30 }
 0x4f2   : > { %3835 = vst.msk [vmem:[%s614_s22] sm:$0xff] %vm3623_vm8, %v3834_v4 }
 0x4f3 PF: > { %s30_s16 = sadd.s32 1, %s5363_s16   ;;  %s6242_s5 = sld [smem:[#allocation31_spill]] }
 0x4f4   : > { %p27_p12 = scmp.ge.s32.totalorder %s30_s16, 6   ;;  %s6243_s19 = sld [smem:[#allocation29_spill]] }
 0x4f5   : > { %s6244_s18 = sld [smem:[#allocation30_spill]]  ;;  %s6245_s30 = smov %s5339_s10 }
 0x4f6   : > { %s6246_s10 = smov %s5343_s11  ;;  %s6248_s12 = smov %s5355_s14 }
 0x4f7   : > { %s6249_s13 = smov %s5359_s15  ;;  %29 = sbr.rel (!%p27_p12) target bundleno = 16 (0x10), region = 174 }
 0x4f9   : > { %s6247_s11 = smov %s6242_s5 }
 0x4fa   : > { %s6250_s14 = smov %s6243_s19 }
 0x4fb   : > { %s6251_s15 = smov %s6244_s18 }
 0x4fe   :  { %3869 = vsyncpa [#allocation7], 1 }
 0x4ff   :  { %3871 = vsyncpa [#allocation7 + $0x1], 1 }
 0x500   :  { %3872 = vsyncpa [#allocation9], 1 }
 0x501   :  { %3874 = vsyncpa [#allocation9 + $0x1], 1 }
 0x502   :  { %3875 = vsyncpa [#allocation12], 1 }
 0x503   :  { %3877 = vsyncpa [#allocation12 + $0x1], 1 }
 0x504   :  { %3878 = vsyncpa [#allocation15], 1 }

</bundles_post_ra>
